<compile_context>
chip_gen: v7x
topology: tpu7x:2x2x1
jax: 0.10.0
libtpu: 0.0.40
codegen_flags: <defaults>
</compile_context>

<pallas_src>
import jax
import jax.numpy as jnp
from jax.experimental import pallas as pl
from jax.experimental.pallas import tpu as pltpu

LANE = 128


def _bottleneck_kernel(x_ref, w1_ref, b1_ref, w2_ref, b2_ref, w3_ref, b3_ref,
                       o_ref, y1p_ref):
    """Grid = (batch, H-tile). All matmuls bf16 -> f32 accumulate."""
    _, H, W, Cinp = x_ref.shape
    Cp = w1_ref.shape[1]            # padded bottleneck width
    Coutp = w3_ref.shape[1]         # padded output channels (== Cinp)
    TH = o_ref.shape[1]             # output rows per tile
    HW = H * W
    f32, bf16 = jnp.float32, jnp.bfloat16
    t = pl.program_id(1)

    # ---- once per image (t == 0): conv1 (1x1) + folded-BN bias + relu over the
    # ---- resident full-image x block, then build the W-direction im2col
    # ---- [kw=0 | kw=1 | kw=2] into the H-padded persistent scratch.
    @pl.when(t == 0)
    def _():
        x_bf = x_ref[0].reshape(HW, Cinp)                            # bf16
        y1 = jnp.dot(x_bf, w1_ref[...], preferred_element_type=f32)  # (HW, Cp)
        y1 = jnp.maximum(y1 + b1_ref[...], 0.0)

        # W-shifted neighbours via XLU roll + boundary masks; the roll
        # wrap-around rows land exactly on the masked columns.  (Roll kept in
        # f32: packed-sublane bf16 rotate support is uncertain, and this runs
        # once per image, off the per-tile critical path.)
        w_pos = jax.lax.broadcasted_iota(jnp.int32, (HW, 1), 0) % W
        left = jnp.where(w_pos == 0, 0.0, pltpu.roll(y1, shift=1, axis=0))
        right = jnp.where(w_pos == W - 1, 0.0, pltpu.roll(y1, shift=HW - 1, axis=0))

        y1p_ref[0] = jnp.zeros((W, 3 * Cp), bf16)            # top halo row
        y1p_ref[H + 1] = jnp.zeros((W, 3 * Cp), bf16)        # bottom halo row
        # 128-aligned lane-slice stores (no lane concat, unmasked vst).
        y1p_ref[1:H + 1, :, 0:Cp] = left.astype(bf16).reshape(H, W, Cp)
        y1p_ref[1:H + 1, :, Cp:2 * Cp] = y1.astype(bf16).reshape(H, W, Cp)
        y1p_ref[1:H + 1, :, 2 * Cp:3 * Cp] = right.astype(bf16).reshape(H, W, Cp)

    # ---- per H-tile: conv2 (3x3) as a single K = 9*Cp matmul --------------------
    r0 = pl.multiple_of(t * TH, TH)
    # three H-taps: leading-dim slices of the scratch (free views), each already
    # carrying the [left|center|right] W-taps on 3*Cp (multiple of 128) lanes.
    taps = [y1p_ref[pl.ds(r0 + kh, TH), :, :].reshape(TH * W, 3 * Cp)
            for kh in range(3)]
    patch = jnp.concatenate(taps, axis=-1)                            # (TH*W, 9*Cp)
    y2 = jnp.dot(patch, w2_ref[...], preferred_element_type=f32)      # (TH*W, Cp)
    y2 = jnp.maximum(y2 + b2_ref[...], 0.0)

    # ---- conv3 (1x1) + bias + residual + relu -----------------------------------
    y3 = jnp.dot(y2.astype(bf16), w3_ref[...], preferred_element_type=f32)
    identity = x_ref[0, pl.ds(r0, TH), :, :].reshape(TH * W, Coutp).astype(f32)
    out = jnp.maximum(y3 + b3_ref[...] + identity, 0.0)
    o_ref[0] = out.reshape(TH, W, Coutp).astype(o_ref.dtype)


# ----------------------------- wrapper ---------------------------------------

def _round_up(n, m=LANE):
    return ((n + m - 1) // m) * m


def _pick_tile_h(H):
    for th in (8, 16, 32, 4, 2):
        if th <= H and H % th == 0:
            return th
    return H


def _vmem_limit_bytes(est_bytes):
    """Request actual usage + headroom, capped below the physical per-core VMEM."""
    try:
        cap = pltpu.get_tpu_info().vmem_capacity_bytes
    except Exception:
        cap = 64 * 1024 * 1024        # assume the smallest (v7x) per-core VMEM
    want = est_bytes + 8 * 1024 * 1024          # Mosaic-internal scratch headroom
    return int(min(max(want, 16 * 1024 * 1024), cap * 3 // 4))


def bottleneck_forward_nhwc(x, params, *, stride=1, tile_h=None):
    """x: (N, H, W, Cin_padded) bf16 NHWC, channels zero-padded to a multiple of 128.

    Returns (N, H, W, Cout_padded) bf16; padded output channels are exact zeros.
    """
    assert stride == 1, "only the stride=1 / i_downsample=None path is implemented"
    N, H, W, Cinp = x.shape
    Cp = params["w1"].shape[1]
    Coutp = params["w3"].shape[1]
    assert params["w1"].shape[0] == Cinp and Cinp == Coutp, (
        "identity path requires in_channels == 4*out_channels")

    TH = tile_h if tile_h is not None else _pick_tile_h(H)
    assert H % TH == 0
    NT = H // TH

    const = lambda *blk: pl.BlockSpec(blk, lambda n, t: (0,) * len(blk))
    in_specs = [
        # full image per batch index; the index map is t-invariant, so the block
        # is DMA'd once per image and stays resident across its H-tiles.
        pl.BlockSpec((1, H, W, Cinp), lambda n, t: (n, 0, 0, 0)),
        const(Cinp, Cp), const(1, Cp),          # w1 (bf16, BN folded), b1 (f32)
        const(9 * Cp, Cp), const(1, Cp),        # w2 (bf16, im2col-packed), b2
        const(Cp, Coutp), const(1, Coutp),      # w3 (bf16), b3
    ]
    out_specs = pl.BlockSpec((1, TH, W, Coutp), lambda n, t: (n, t, 0, 0))
    scratch = [pltpu.VMEM((H + 2, W, 3 * Cp), jnp.bfloat16)]   # per-image y1 im2col

    # VMEM estimate: pipelined blocks are double-buffered (x, out, weights) plus
    # the persistent scratch and biases.
    est = (2 * H * W * Cinp * 2                       # x block (bf16) x 2 buffers
           + 2 * TH * W * Coutp * 2                   # out block (bf16) x 2 buffers
           + 2 * 2 * (Cinp * Cp + 9 * Cp * Cp + Cp * Coutp)   # weights (bf16) x 2
           + 2 * 4 * (2 * Cp + Coutp)                 # biases (f32) x 2
           + (H + 2) * W * 3 * Cp * 2)                # scratch (bf16)

    out = pl.pallas_call(
        _bottleneck_kernel,
        out_shape=jax.ShapeDtypeStruct((N, H, W, Coutp), jnp.bfloat16),
        grid_spec=pltpu.PrefetchScalarGridSpec(
            num_scalar_prefetch=0,
            grid=(N, NT),
            in_specs=in_specs,
            out_specs=out_specs,
            scratch_shapes=scratch,
        ),
        compiler_params=pltpu.CompilerParams(
            dimension_semantics=("parallel", "arbitrary"),
            vmem_limit_bytes=_vmem_limit_bytes(est),
        ),
    )(x, params["w1"], params["b1"], params["w2"], params["b2"],
      params["w3"], params["b3"])
    return out


def bottleneck_forward(x_nchw, params, *, stride=1):
    """PyTorch-layout adapter: (N, Cin, H, W) f32 -> (N, 4*out_channels, H, W) f32.

    # TODO(synk): keep activations NHWC/bf16/128-padded across the whole network
    # so these pad/transpose ops (extra HBM passes) disappear.
    """
    N, Cin, H, W = x_nchw.shape
    Cinp = params["w1"].shape[0]
    x = jnp.transpose(x_nchw, (0, 2, 3, 1)).astype(jnp.bfloat16)
    x = jnp.pad(x, ((0, 0), (0, 0), (0, 0), (0, Cinp - Cin)))
    y = bottleneck_forward_nhwc(x, params, stride=stride)
    y = y[..., :params["cout"]].astype(x_nchw.dtype)
    return jnp.transpose(y, (0, 3, 1, 2))


# ----------------------------- parameters / reference ------------------------

def _fold_bn(gamma, beta, mean, var, conv_bias, eps=1e-5):
    # bn(conv(x) + b) == conv(x) * scale + bias   (eval mode)
    inv = gamma * jax.lax.rsqrt(var + eps)
    return inv, beta + inv * (conv_bias - mean)


def _pad_to(a, axis, size):
    pad = [(0, 0)] * a.ndim
    pad[axis] = (0, size - a.shape[axis])
    return jnp.pad(a, pad)


def init_raw_params(key, in_channels, out_channels):
    """Raw conv weights (HWIO-style), conv biases and BN statistics."""
    C, Cout = out_channels, 4 * out_channels
    ks = jax.random.split(key, 9)
    rnd = lambda k, shape, s=0.1: s * jax.random.normal(k, shape, jnp.float32)

    def bn(k, n):
        k1, k2, k3, k4 = jax.random.split(k, 4)
        gamma = 1.0 + 0.1 * jax.random.normal(k1, (n,), jnp.float32)
        beta = 0.1 * jax.random.normal(k2, (n,), jnp.float32)
        mean = 0.1 * jax.random.normal(k3, (n,), jnp.float32)
        var = jnp.abs(jax.random.normal(k4, (n,), jnp.float32)) + 0.5
        return gamma, beta, mean, var

    return dict(
        w1=rnd(ks[0], (in_channels, C)), b1=rnd(ks[1], (C,)),
        w2=rnd(ks[2], (3, 3, C, C)),     b2=rnd(ks[3], (C,)),
        w3=rnd(ks[4], (C, Cout)),        b3=rnd(ks[5], (Cout,)),
        bn1=bn(ks[6], C), bn2=bn(ks[7], C), bn3=bn(ks[8], Cout))


def prepare_params(raw):
    """Fold eval-mode BN into the convs, pad channels to 128 lanes, cast bf16."""
    Cin, C = raw["w1"].shape
    Cout = raw["w3"].shape[1]
    Cinp, Cp, Coutp = _round_up(Cin), _round_up(C), _round_up(Cout)

    s1, b1 = _fold_bn(*raw["bn1"], raw["b1"])
    s2, b2 = _fold_bn(*raw["bn2"], raw["b2"])
    s3, b3 = _fold_bn(*raw["bn3"], raw["b3"])

    w1 = raw["w1"] * s1[None, :]                              # (Cin, C)
    w1 = _pad_to(_pad_to(w1, 0, Cinp), 1, Cp).astype(jnp.bfloat16)

    # (kh, kw, Cin, Cout) HWIO: scale Cout, pad channels, flatten to (9*Cp, Cp).
    # Row order (kh, kw, ci) matches the kernel's [H-tap | W-tap | channel] lanes.
    w2 = raw["w2"] * s2[None, None, None, :]
    w2 = _pad_to(_pad_to(w2, 2, Cp), 3, Cp)
    w2 = w2.reshape(9 * Cp, Cp).astype(jnp.bfloat16)

    w3 = raw["w3"] * s3[None, :]                              # (C, 4C)
    w3 = _pad_to(_pad_to(w3, 0, Cp), 1, Coutp).astype(jnp.bfloat16)

    pad_b = lambda v, n: jnp.pad(v, (0, n - v.shape[0])).reshape(1, n).astype(jnp.float32)
    return dict(w1=w1, b1=pad_b(b1, Cp), w2=w2, b2=pad_b(b2, Cp),
                w3=w3, b3=pad_b(b3, Coutp), cout=Cout)


def reference_forward_nhwc(x, raw, eps=1e-5):
    """Pure-JAX f32 reference (lax convolutions, eval-mode BatchNorm)."""
    def conv(y, w, pad):
        return jax.lax.conv_general_dilated(
            y, w, (1, 1), pad, dimension_numbers=("NHWC", "HWIO", "NHWC"))
    def bn(y, p):
        gamma, beta, mean, var = p
        return (y - mean) * (gamma * jax.lax.rsqrt(var + eps)) + beta
    y = conv(x, raw["w1"].reshape(1, 1, *raw["w1"].shape), "VALID") + raw["b1"]
    y = jnp.maximum(bn(y, raw["bn1"]), 0.0)
    y = conv(y, raw["w2"], ((1, 1), (1, 1))) + raw["b2"]
    y = jnp.maximum(bn(y, raw["bn2"]), 0.0)
    y = conv(y, raw["w3"].reshape(1, 1, *raw["w3"].shape), "VALID") + raw["b3"]
    y = bn(y, raw["bn3"])
    return jnp.maximum(y + x, 0.0)


if __name__ == "__main__":
    key = jax.random.PRNGKey(0)
    kx, kp = jax.random.split(key)

    # identity path requires in_channels == 4*out_channels
    N, in_channels, out_channels, H, W = 2, 16, 4, 16, 16
    x_nchw = jax.random.normal(kx, (N, in_channels, H, W), jnp.float32)   # PyTorch layout

    raw = init_raw_params(kp, in_channels, out_channels)
    params = prepare_params(raw)

    # Kernel-native activation layout: NHWC, bf16, channels zero-padded to 128
    # lanes (a real NHWC network would keep this layout end-to-end).
    Cinp = params["w1"].shape[0]
    x_nhwc = jnp.transpose(x_nchw, (0, 2, 3, 1)).astype(jnp.bfloat16)
    x_in = jnp.pad(x_nhwc, ((0, 0), (0, 0), (0, 0), (0, Cinp - in_channels)))

    y_pad = jax.block_until_ready(bottleneck_forward_nhwc(x_in, params))

    cout = 4 * out_channels
    assert y_pad.shape == (N, H, W, Cinp)
    y = y_pad[..., :cout].astype(jnp.float32)

    # f32 lax-conv reference on the same bf16-quantized input (kernel I/O and
    # matmuls are bf16 -> loose tolerance).
    ref = reference_forward_nhwc(x_nhwc.astype(jnp.float32), raw)
    max_err = float(jnp.max(jnp.abs(y - ref)))
    mean_err = float(jnp.mean(jnp.abs(y - ref)))
    assert max_err < 1e-1 and mean_err < 1e-2, (
        f"kernel/reference mismatch: max={max_err} mean={mean_err}")

    # padded output channels must be exact zeros (zero weights/bias/identity)
    assert float(jnp.max(jnp.abs(y_pad[..., cout:].astype(jnp.float32)))) == 0.0

    print("KERNEL_OK")
</pallas_src>

<mosaic_0001>
module attributes {stable_mosaic.version = 11 : i64} {
  func.func @_bottleneck_kernel(%arg0: i32, %arg1: i32, %arg2: memref<1x16x16x128xbf16, #tpu.memory_space<vmem>>, %arg3: memref<128x128xbf16, #tpu.memory_space<vmem>>, %arg4: memref<1x128xf32, #tpu.memory_space<vmem>>, %arg5: memref<1152x128xbf16, #tpu.memory_space<vmem>>, %arg6: memref<1x128xf32, #tpu.memory_space<vmem>>, %arg7: memref<128x128xbf16, #tpu.memory_space<vmem>>, %arg8: memref<1x128xf32, #tpu.memory_space<vmem>>, %arg9: memref<1x8x16x128xbf16, #tpu.memory_space<vmem>>, %arg10: memref<18x16x384xbf16, #tpu.memory_space<vmem>>) attributes {dimension_semantics = [#tpu.dimension_semantics<parallel>, #tpu.dimension_semantics<arbitrary>], iteration_bounds = array<i64: 2, 2>, scalar_prefetch = 0 : i64, scratch_operands = 1 : i64, tpu.core_type = #tpu.core_type<tc>, window_params = [{transform_indices = @transform_0, window_bounds = array<i64: 1, 16, 16, 128>}, {pipeline_mode = #tpu.pipeline_mode<synchronous>, transform_indices = @transform_1, window_bounds = array<i64: 128, 128>}, {pipeline_mode = #tpu.pipeline_mode<synchronous>, transform_indices = @transform_2, window_bounds = array<i64: 1, 128>}, {pipeline_mode = #tpu.pipeline_mode<synchronous>, transform_indices = @transform_3, window_bounds = array<i64: 1152, 128>}, {pipeline_mode = #tpu.pipeline_mode<synchronous>, transform_indices = @transform_4, window_bounds = array<i64: 1, 128>}, {pipeline_mode = #tpu.pipeline_mode<synchronous>, transform_indices = @transform_5, window_bounds = array<i64: 128, 128>}, {pipeline_mode = #tpu.pipeline_mode<synchronous>, transform_indices = @transform_6, window_bounds = array<i64: 1, 128>}, {transform_indices = @transform_7, window_bounds = array<i64: 1, 8, 16, 128>}]} {
    %c0_i32 = arith.constant 0 : i32
    %0 = arith.cmpi eq, %arg1, %c0_i32 : i32
    %1 = arith.extui %0 : i1 to i32
    %c0_i32_0 = arith.constant 0 : i32
    %2 = arith.cmpi ne, %1, %c0_i32_0 : i32
    scf.if %2 {
      %c0_25 = arith.constant 0 : index
      %c0_26 = arith.constant 0 : index
      %c0_27 = arith.constant 0 : index
      %c0_28 = arith.constant 0 : index
      %44 = vector.load %arg2[%c0_25, %c0_26, %c0_27, %c0_28] : memref<1x16x16x128xbf16, #tpu.memory_space<vmem>>, vector<1x16x16x128xbf16>
      %45 = vector.shape_cast %44 : vector<1x16x16x128xbf16> to vector<16x16x128xbf16>
      %46 = vector.shape_cast %45 : vector<16x16x128xbf16> to vector<256x128xbf16>
      %c0_29 = arith.constant 0 : index
      %c0_30 = arith.constant 0 : index
      %47 = vector.load %arg3[%c0_29, %c0_30] : memref<128x128xbf16, #tpu.memory_space<vmem>>, vector<128x128xbf16>
      %cst_31 = arith.constant dense<0.000000e+00> : vector<256x128xf32>
      %48 = tpu.matmul %46, %47, %cst_31 {dimension_numbers = #tpu.dot_dimension_numbers<[1], [0], [0], [1], [0, 0, 1, 1], [], []>} : vector<256x128xbf16>, vector<128x128xbf16>, vector<256x128xf32> -> vector<256x128xf32>
      %c0_32 = arith.constant 0 : index
      %c0_33 = arith.constant 0 : index
      %49 = vector.load %arg4[%c0_32, %c0_33] : memref<1x128xf32, #tpu.memory_space<vmem>>, vector<1x128xf32>
      %50 = vector.broadcast %49 : vector<1x128xf32> to vector<256x128xf32>
      %51 = arith.addf %48, %50 : vector<256x128xf32>
      %cst_34 = arith.constant 0.000000e+00 : f32
      %52 = vector.broadcast %cst_34 : f32 to vector<256x128xf32>
      %53 = arith.maximumf %51, %52 : vector<256x128xf32>
      %54 = tpu.iota {dimensions = array<i32: 0>} : vector<256x1xi32>
      %c16_i32 = arith.constant 16 : i32
      %c0_i32_35 = arith.constant 0 : i32
      %55 = arith.cmpi eq, %c16_i32, %c0_i32_35 : i32
      %c1_i32_36 = arith.constant 1 : i32
      %56 = arith.select %55, %c1_i32_36, %c16_i32 : i32
      %57 = vector.broadcast %56 : i32 to vector<256x1xi32>
      %58 = arith.remsi %54, %57 : vector<256x1xi32>
      %c0_i32_37 = arith.constant 0 : i32
      %59 = vector.broadcast %c0_i32_37 : i32 to vector<256x1xi32>
      %60 = arith.cmpi ne, %58, %59 : vector<256x1xi32>
      %c0_i32_38 = arith.constant 0 : i32
      %61 = vector.broadcast %c0_i32_38 : i32 to vector<256x1xi32>
      %62 = arith.cmpi slt, %58, %61 : vector<256x1xi32>
      %c0_i32_39 = arith.constant 0 : i32
      %63 = arith.cmpi slt, %56, %c0_i32_39 : i32
      %64 = vector.broadcast %63 : i1 to vector<256x1xi1>
      %65 = vector.broadcast %64 : vector<256x1xi1> to vector<256x1xi1>
      %66 = arith.xori %62, %65 : vector<256x1xi1>
      %67 = arith.andi %66, %60 : vector<256x1xi1>
      %68 = vector.broadcast %56 : i32 to vector<256x1xi32>
      %69 = arith.addi %58, %68 : vector<256x1xi32>
      %70 = arith.select %67, %69, %58 : vector<256x1xi1>, vector<256x1xi32>
      %c0_i32_40 = arith.constant 0 : i32
      %71 = vector.broadcast %c0_i32_40 : i32 to vector<256x1xi32>
      %72 = arith.cmpi eq, %70, %71 : vector<256x1xi32>
      %c1_i32_41 = arith.constant 1 : i32
      %73 = tpu.dynamic_rotate %53 by %c1_i32_41 dim 0 : vector<256x128xf32>, i32 -> vector<256x128xf32>
      %cst_42 = arith.constant 0.000000e+00 : f32
      %74 = vector.shape_cast %72 : vector<256x1xi1> to vector<256x1xi1>
      %75 = vector.broadcast %74 : vector<256x1xi1> to vector<256x128xi1>
      %76 = vector.broadcast %cst_42 : f32 to vector<256x128xf32>
      %77 = arith.select %75, %76, %73 : vector<256x128xi1>, vector<256x128xf32>
      %c15_i32 = arith.constant 15 : i32
      %78 = vector.broadcast %c15_i32 : i32 to vector<256x1xi32>
      %79 = arith.cmpi eq, %70, %78 : vector<256x1xi32>
      %c255_i32 = arith.constant 255 : i32
      %80 = tpu.dynamic_rotate %53 by %c255_i32 dim 0 : vector<256x128xf32>, i32 -> vector<256x128xf32>
      %cst_43 = arith.constant 0.000000e+00 : f32
      %81 = vector.shape_cast %79 : vector<256x1xi1> to vector<256x1xi1>
      %82 = vector.broadcast %81 : vector<256x1xi1> to vector<256x128xi1>
      %83 = vector.broadcast %cst_43 : f32 to vector<256x128xf32>
      %84 = arith.select %82, %83, %80 : vector<256x128xi1>, vector<256x128xf32>
      %cst_44 = arith.constant 0.000000e+00 : bf16
      %85 = vector.broadcast %cst_44 : bf16 to vector<16x384xbf16>
      %c0_45 = arith.constant 0 : index
      %c0_46 = arith.constant 0 : index
      %c0_47 = arith.constant 0 : index
      %86 = vector.load %arg10[%c0_45, %c0_46, %c0_47] : memref<18x16x384xbf16, #tpu.memory_space<vmem>>, vector<1x16x384xbf16>
      %87 = vector.shape_cast %86 : vector<1x16x384xbf16> to vector<16x384xbf16>
      %88 = vector.shape_cast %85 : vector<16x384xbf16> to vector<1x16x384xbf16>
      tpu.vector_store %arg10[%c0_45, %c0_46, %c0_47], %88 {strides = array<i32>} : memref<18x16x384xbf16, #tpu.memory_space<vmem>>, vector<1x16x384xbf16>,
      %cst_48 = arith.constant 0.000000e+00 : bf16
      %89 = vector.broadcast %cst_48 : bf16 to vector<16x384xbf16>
      %c17 = arith.constant 17 : index
      %c0_49 = arith.constant 0 : index
      %c0_50 = arith.constant 0 : index
      %90 = vector.load %arg10[%c17, %c0_49, %c0_50] : memref<18x16x384xbf16, #tpu.memory_space<vmem>>, vector<1x16x384xbf16>
      %91 = vector.shape_cast %90 : vector<1x16x384xbf16> to vector<16x384xbf16>
      %92 = vector.shape_cast %89 : vector<16x384xbf16> to vector<1x16x384xbf16>
      tpu.vector_store %arg10[%c17, %c0_49, %c0_50], %92 {strides = array<i32>} : memref<18x16x384xbf16, #tpu.memory_space<vmem>>, vector<1x16x384xbf16>,
      %93 = arith.truncf %77 : vector<256x128xf32> to vector<256x128xbf16>
      %94 = vector.shape_cast %93 : vector<256x128xbf16> to vector<16x16x128xbf16>
      %c1 = arith.constant 1 : index
      %c0_51 = arith.constant 0 : index
      %c0_52 = arith.constant 0 : index
      %95 = vector.load %arg10[%c1, %c0_51, %c0_52] : memref<18x16x384xbf16, #tpu.memory_space<vmem>>, vector<16x16x128xbf16>
      tpu.vector_store %arg10[%c1, %c0_51, %c0_52], %94 {strides = array<i32>} : memref<18x16x384xbf16, #tpu.memory_space<vmem>>, vector<16x16x128xbf16>,
      %96 = arith.truncf %53 : vector<256x128xf32> to vector<256x128xbf16>
      %97 = vector.shape_cast %96 : vector<256x128xbf16> to vector<16x16x128xbf16>
      %c1_53 = arith.constant 1 : index
      %c0_54 = arith.constant 0 : index
      %c128 = arith.constant 128 : index
      %98 = vector.load %arg10[%c1_53, %c0_54, %c128] : memref<18x16x384xbf16, #tpu.memory_space<vmem>>, vector<16x16x128xbf16>
      tpu.vector_store %arg10[%c1_53, %c0_54, %c128], %97 {strides = array<i32>} : memref<18x16x384xbf16, #tpu.memory_space<vmem>>, vector<16x16x128xbf16>,
      %99 = arith.truncf %84 : vector<256x128xf32> to vector<256x128xbf16>
      %100 = vector.shape_cast %99 : vector<256x128xbf16> to vector<16x16x128xbf16>
      %c1_55 = arith.constant 1 : index
      %c0_56 = arith.constant 0 : index
      %c256 = arith.constant 256 : index
      %101 = vector.load %arg10[%c1_55, %c0_56, %c256] : memref<18x16x384xbf16, #tpu.memory_space<vmem>>, vector<16x16x128xbf16>
      tpu.vector_store %arg10[%c1_55, %c0_56, %c256], %100 {strides = array<i32>} : memref<18x16x384xbf16, #tpu.memory_space<vmem>>, vector<16x16x128xbf16>,
    } else {
    }
    %c8_i32 = arith.constant 8 : i32
    %3 = arith.muli %arg1, %c8_i32 : i32
    %4 = tpu.assume_multiple %3, 8 : i32
    %c0_i32_1 = arith.constant 0 : i32
    %5 = arith.addi %4, %c0_i32_1 : i32
    %6 = arith.index_cast %5 : i32 to index
    %c0 = arith.constant 0 : index
    %c0_2 = arith.constant 0 : index
    %7 = vector.load %arg10[%6, %c0, %c0_2] : memref<18x16x384xbf16, #tpu.memory_space<vmem>>, vector<8x16x384xbf16>
    %8 = vector.shape_cast %7 : vector<8x16x384xbf16> to vector<128x384xbf16>
    %c1_i32 = arith.constant 1 : i32
    %9 = arith.addi %4, %c1_i32 : i32
    %10 = arith.index_cast %9 : i32 to index
    %c0_3 = arith.constant 0 : index
    %c0_4 = arith.constant 0 : index
    %11 = vector.load %arg10[%10, %c0_3, %c0_4] : memref<18x16x384xbf16, #tpu.memory_space<vmem>>, vector<8x16x384xbf16>
    %12 = vector.shape_cast %11 : vector<8x16x384xbf16> to vector<128x384xbf16>
    %c2_i32 = arith.constant 2 : i32
    %13 = arith.addi %4, %c2_i32 : i32
    %14 = arith.index_cast %13 : i32 to index
    %c0_5 = arith.constant 0 : index
    %c0_6 = arith.constant 0 : index
    %15 = vector.load %arg10[%14, %c0_5, %c0_6] : memref<18x16x384xbf16, #tpu.memory_space<vmem>>, vector<8x16x384xbf16>
    %16 = vector.shape_cast %15 : vector<8x16x384xbf16> to vector<128x384xbf16>
    %17 = tpu.concatenate %8, %12, %16 in 1 : vector<128x384xbf16>, vector<128x384xbf16>, vector<128x384xbf16> -> vector<128x1152xbf16>
    %c0_7 = arith.constant 0 : index
    %c0_8 = arith.constant 0 : index
    %18 = vector.load %arg5[%c0_7, %c0_8] : memref<1152x128xbf16, #tpu.memory_space<vmem>>, vector<1152x128xbf16>
    %cst = arith.constant dense<0.000000e+00> : vector<128x128xf32>
    %19 = tpu.matmul %17, %18, %cst {dimension_numbers = #tpu.dot_dimension_numbers<[1], [0], [0], [1], [0, 0, 1, 1], [], []>} : vector<128x1152xbf16>, vector<1152x128xbf16>, vector<128x128xf32> -> vector<128x128xf32>
    %c0_9 = arith.constant 0 : index
    %c0_10 = arith.constant 0 : index
    %20 = vector.load %arg6[%c0_9, %c0_10] : memref<1x128xf32, #tpu.memory_space<vmem>>, vector<1x128xf32>
    %21 = vector.broadcast %20 : vector<1x128xf32> to vector<128x128xf32>
    %22 = arith.addf %19, %21 : vector<128x128xf32>
    %cst_11 = arith.constant 0.000000e+00 : f32
    %23 = vector.broadcast %cst_11 : f32 to vector<128x128xf32>
    %24 = arith.maximumf %22, %23 : vector<128x128xf32>
    %25 = arith.truncf %24 : vector<128x128xf32> to vector<128x128xbf16>
    %c0_12 = arith.constant 0 : index
    %c0_13 = arith.constant 0 : index
    %26 = vector.load %arg7[%c0_12, %c0_13] : memref<128x128xbf16, #tpu.memory_space<vmem>>, vector<128x128xbf16>
    %cst_14 = arith.constant dense<0.000000e+00> : vector<128x128xf32>
    %27 = tpu.matmul %25, %26, %cst_14 {dimension_numbers = #tpu.dot_dimension_numbers<[1], [0], [0], [1], [0, 0, 1, 1], [], []>} : vector<128x128xbf16>, vector<128x128xbf16>, vector<128x128xf32> -> vector<128x128xf32>
    %c0_15 = arith.constant 0 : index
    %28 = arith.index_cast %4 : i32 to index
    %c0_16 = arith.constant 0 : index
    %c0_17 = arith.constant 0 : index
    %29 = vector.load %arg2[%c0_15, %28, %c0_16, %c0_17] : memref<1x16x16x128xbf16, #tpu.memory_space<vmem>>, vector<1x8x16x128xbf16>
    %30 = vector.shape_cast %29 : vector<1x8x16x128xbf16> to vector<8x16x128xbf16>
    %31 = vector.shape_cast %30 : vector<8x16x128xbf16> to vector<128x128xbf16>
    %32 = arith.extf %31 : vector<128x128xbf16> to vector<128x128xf32>
    %c0_18 = arith.constant 0 : index
    %c0_19 = arith.constant 0 : index
    %33 = vector.load %arg8[%c0_18, %c0_19] : memref<1x128xf32, #tpu.memory_space<vmem>>, vector<1x128xf32>
    %34 = vector.broadcast %33 : vector<1x128xf32> to vector<128x128xf32>
    %35 = arith.addf %27, %34 : vector<128x128xf32>
    %36 = arith.addf %35, %32 : vector<128x128xf32>
    %cst_20 = arith.constant 0.000000e+00 : f32
    %37 = vector.broadcast %cst_20 : f32 to vector<128x128xf32>
    %38 = arith.maximumf %36, %37 : vector<128x128xf32>
    %39 = vector.shape_cast %38 : vector<128x128xf32> to vector<8x16x128xf32>
    %40 = arith.truncf %39 : vector<8x16x128xf32> to vector<8x16x128xbf16>
    %c0_21 = arith.constant 0 : index
    %c0_22 = arith.constant 0 : index
    %c0_23 = arith.constant 0 : index
    %c0_24 = arith.constant 0 : index
    %41 = vector.load %arg9[%c0_21, %c0_22, %c0_23, %c0_24] : memref<1x8x16x128xbf16, #tpu.memory_space<vmem>>, vector<1x8x16x128xbf16>
    %42 = vector.shape_cast %41 : vector<1x8x16x128xbf16> to vector<8x16x128xbf16>
    %43 = vector.shape_cast %40 : vector<8x16x128xbf16> to vector<1x8x16x128xbf16>
    tpu.vector_store %arg9[%c0_21, %c0_22, %c0_23, %c0_24], %43 {strides = array<i32>} : memref<1x8x16x128xbf16, #tpu.memory_space<vmem>>, vector<1x8x16x128xbf16>,
    return
  }
  func.func @transform_0(%arg0: i32, %arg1: i32) -> (i32, i32, i32, i32) {
    %c0_i32 = arith.constant 0 : i32
    %c0_i32_0 = arith.constant 0 : i32
    %c0_i32_1 = arith.constant 0 : i32
    %c0_i32_2 = arith.constant 0 : i32
    return %arg0, %c0_i32, %c0_i32_0, %c0_i32_1 : i32, i32, i32, i32
  }
  func.func @transform_1(%arg0: i32, %arg1: i32) -> (i32, i32) {
    %c0_i32 = arith.constant 0 : i32
    %c0_i32_0 = arith.constant 0 : i32
    %c0_i32_1 = arith.constant 0 : i32
    return %c0_i32, %c0_i32_0 : i32, i32
  }
  func.func @transform_2(%arg0: i32, %arg1: i32) -> (i32, i32) {
    %c0_i32 = arith.constant 0 : i32
    %c0_i32_0 = arith.constant 0 : i32
    %c0_i32_1 = arith.constant 0 : i32
    return %c0_i32, %c0_i32_0 : i32, i32
  }
  func.func @transform_3(%arg0: i32, %arg1: i32) -> (i32, i32) {
    %c0_i32 = arith.constant 0 : i32
    %c0_i32_0 = arith.constant 0 : i32
    %c0_i32_1 = arith.constant 0 : i32
    return %c0_i32, %c0_i32_0 : i32, i32
  }
  func.func @transform_4(%arg0: i32, %arg1: i32) -> (i32, i32) {
    %c0_i32 = arith.constant 0 : i32
    %c0_i32_0 = arith.constant 0 : i32
    %c0_i32_1 = arith.constant 0 : i32
    return %c0_i32, %c0_i32_0 : i32, i32
  }
  func.func @transform_5(%arg0: i32, %arg1: i32) -> (i32, i32) {
    %c0_i32 = arith.constant 0 : i32
    %c0_i32_0 = arith.constant 0 : i32
    %c0_i32_1 = arith.constant 0 : i32
    return %c0_i32, %c0_i32_0 : i32, i32
  }
  func.func @transform_6(%arg0: i32, %arg1: i32) -> (i32, i32) {
    %c0_i32 = arith.constant 0 : i32
    %c0_i32_0 = arith.constant 0 : i32
    %c0_i32_1 = arith.constant 0 : i32
    return %c0_i32, %c0_i32_0 : i32, i32
  }
  func.func @transform_7(%arg0: i32, %arg1: i32) -> (i32, i32, i32, i32) {
    %c0_i32 = arith.constant 0 : i32
    %c0_i32_0 = arith.constant 0 : i32
    %c0_i32_1 = arith.constant 0 : i32
    return %arg0, %arg1, %c0_i32, %c0_i32_0 : i32, i32, i32, i32
  }
}

</mosaic_0001>

<bundles_post_ra>
// kernel: tpu_custom_call.1
= control target key start
LH: loop header
LB: loop body
LE: loop exit
PB: predicated region body
PF: predicated region fallthrough
CT: control target
= control target key end

     0   :  { %s6057_s0 = inlined_call_operand.hbm [shape: bf16[2,16,16,128], index: 0, kind: input, shape index: {}]   ;;  %s6058_s1 = inlined_call_operand.hbm [shape: bf16[128,128], index: 1, kind: input, shape index: {}]   ;;  %s6059_s2 = inlined_call_operand.vmem [shape: f32[1,128], index: 2, kind: input, shape index: {}]   ;;  %s6060_s3 = inlined_call_operand.hbm [shape: bf16[1152,128], index: 3, kind: input, shape index: {}]   ;;  %s6061_s4 = inlined_call_operand.vmem [shape: f32[1,128], index: 4, kind: input, shape index: {}]   ;;  %s6062_s5 = inlined_call_operand.hbm [shape: bf16[128,128], index: 5, kind: input, shape index: {}]   ;;  %s6063_s6 = inlined_call_operand.vmem [shape: f32[1,128], index: 6, kind: input, shape index: {}]   ;;  %s6064_s7 = inlined_call_operand.hbm [shape: bf16[2,16,16,128], index: 7, kind: output, shape index: {}]  }
   0x1   :  { %6098 = sst [smem:[#allocation30_spill]] %s6058_s1 }
   0x2   :  { %6099 = sst [smem:[#allocation31_spill]] %s6059_s2 }
   0x3   :  { %6100 = sst [smem:[#allocation32_spill]] %s6060_s3 }
   0x4   :  { %6101 = sst [smem:[#allocation33_spill]] %s6061_s4 }
   0x5   :  { %6102 = sst [smem:[#allocation34_spill]] %s6063_s6 }
   0x6   :  { %6103 = sst [smem:[#allocation35_spill]] %s6064_s7 }
   0x7   :  { %12 = vsyncpa [#allocation4], 0 }
   0x8   :  { %14 = vsyncpa [#allocation4 + $0x1], 0 }
   0x9   :  { %15 = vsyncpa [#allocation7], 0 }
   0xa   :  { %16 = vsyncpa [#allocation10], 0 }
   0xb   :  { %17 = vsyncpa [#allocation5], 0 }
   0xc   :  { %19 = vsyncpa [#allocation5 + $0x1], 0  ;;  %s4585_s24 = smov 0   ;;  %s4587_s25 = smov 0  }
   0xd   :  { %s4589_s26 = smov 0   ;;  %s4591_s27 = smov 0  }
   0xe   :  { %s4593_s28 = smov 0   ;;  %s4595_s29 = smov 0  }
   0xf   :  { %s4597_s30 = smov 0   ;;  %s4599_s8 = smov 0  }
  0x10   :  { %s4601_s9 = smov 0   ;;  %s4603_s10 = smov 0  }
  0x11   :  { %s4605_s11 = smov 0  }
  0x12 LB: > { %6104 = sst [smem:[#allocation16_spill]] %s4493_s24  ;;  %s3296_s12 = sadd.s32 4294967295, %s4533_s11   ;;  %s4533_s11 = sphi %s4605_s11, %s25_s11   ;;  %s4529_s10 = sphi %s4603_s10, %s6277_s10   ;;  %s4525_s9 = sphi %s4601_s9, %s6276_s9   ;;  %s4521_s8 = sphi %s4599_s8, %s6275_s8   ;;  %s4517_s30 = sphi %s4597_s30, %s6274_s30   ;;  %s4513_s29 = sphi %s4595_s29, %s6273_s29   ;;  %s4509_s28 = sphi %s4593_s28, %s6272_s28   ;;  %s4505_s27 = sphi %s4591_s27, %s6271_s27   ;;  %s4501_s26 = sphi %s4589_s26, %s6270_s26   ;;  %s4497_s25 = sphi %s4587_s25, %s6269_s25   ;;  %s4493_s24 = sphi %s4585_s24, %s6268_s24  }
  0x13   : > { %6105 = sst [smem:[#allocation17_spill]] %s4521_s8  ;;  %s3297_s13 = sadd.s32 4294967294, %s4533_s11  }
  0x14   : > { %p57_p0 = scmp.ne.s32.totalorder %s4509_s28, %s4505_s27  ;;  %p4641_p1 = scmp.eq.s32.totalorder %s3296_s12, 0 }
  0x15   : > { %p208_p2 = scmp.ne.s32.totalorder %s4501_s26, %s4497_s25  ;;  %p209_p4 = scmp.eq.s32.totalorder %s3296_s12, 3 }
  0x16   : > { %s6106_s14 = scalar_select %p4641_p1, 1, 0 }
  0x17   : > { %p4650_p3 = por %p4641_p1, %p57_p0  ;;  %p214_p5 = scmp.ne.s32.totalorder %s4497_s25, %s4493_s24 }
  0x18   : > { %p215_p6 = scmp.eq.s32.totalorder %s3297_s13, 3  ;;  %p4656_p7 = por %p209_p4, %p208_p2 }
  0x19   : > { %s6107_s16 = scalar_select %p4650_p3, 1, 0 }
  0x1a   : > { %s6108_s17 = scalar_select %p4656_p7, 1, 0 }
  0x1b   : > { %p3298_p8 = scmp.ge.s32.totalorder %s4533_s11, 1  ;;  %p4661_p9 = por %p215_p6, %p214_p5 }
  0x1c   : > { %6109 = sst [smem:[#allocation18_spill]] %s6108_s17  ;;  %p222_p10 = scmp.lt.s32.totalorder %s4533_s11, 5 }
  0x1d   : > { %s6110_s18 = scalar_select %p4661_p9, 1, 0 }
  0x1e   : > { %p4666_p11 = pnand %p3298_p8, %p222_p10  ;;  %s4535_s20 = smov [#allocation6]  }
  0x1f   : > { %6111 = sst [smem:[#allocation19_spill]] %s6110_s18  ;;  %s234_s21 = sshll.u32 %s4535_s20, 4  ;;  %s4670_s21 = int_to_ptr.vmem [resolvable:$true] %s234_s21 }
  0x20   : > { %s6112_s19 = scalar_select %p4666_p11, 1, 0 }
  0x21   : > { %p4063_p12 = pneg %p4666_p11  ;;  %s4536_s23 = smov [#allocation8]  }
  0x22   : > { %s250_s27 = sshll.u32 %s4536_s23, 4  ;;  %s4537_s12 = smov [#allocation9]   ;;  %s4680_s27 = int_to_ptr.vmem [resolvable:$true] %s250_s27 }
  0x23   : > { %p4676_p13 = pnand %p4063_p12, %p4641_p1  ;;  %s4682_s13 = sshll.u32 %s4537_s12, 4  ;;  %s267_s13 = int_to_ptr.vmem [resolvable:$true] %s4682_s13 }
  0x24   : > { %s6114_s1 = sld [smem:[#allocation30_spill]] }
  0x25   : > { %p4692_p2 = pneg %p4676_p13 }
  0x2a   : > { %s4289_s20 = scalar_lea.hbm %s6114_s1, 1024 }
  0x2b   : > { %p4290_p0 = scmp.ne.s32.totalorder %s6114_s1, %s4289_s20  ;;  %p4296_p6 = scmp.lt.u32.totalorder %s4289_s20, %s6114_s1 }
  0x2d   : > { %p4292_p4 = pnand %p4692_p2, %p4290_p0 }
  0x2f   : > { %p4293_p5 = pneg %p4292_p4 }
  0x31   : > { %p4298_p8 = pnand %p4296_p6, %p4293_p5 }
  0x33   : > { %4301 = shalt.err (!%p4298_p8)
}
  0x34   : > { %s4302_s7 = scalar_lea.vmem %s4670_s21, 1024  ;;  %p4310_p7 = scmp.lt.s32.totalorder %s4670_s21, %s4670_s21 }
  0x35   : > { %p4303_p10 = scmp.ne.s32.totalorder %s4670_s21, %s4302_s7  ;;  %p4311_p1 = scmp.lt.s32.totalorder %s4302_s7, %s4302_s7 }
  0x37   : > { %p4305_p12 = pnand %p4303_p10, %p4692_p2  ;;  %p4312_p0 = por %p4311_p1, %p4310_p7 }
  0x39   : > { %p4306_p9 = pneg %p4305_p12 }
  0x3b   : > { %p4313_p4 = pnand %p4312_p0, %p4306_p9 }
  0x3d   : > { %4316 = shalt.err (!%p4313_p4)
}
  0x3e   : > { %s6075_s24 = smov 64   ;;  %s6076_s15 = smov 4  }
  0x3f   : > { %4066 = dma.hbm_to_vmem [thread:$0]  (!%p4676_p13), %s6114_s1, 1024, %s4670_s21, [#allocation7], %s6075_s24, %s6075_s24, %s6076_s15  }
  0x40   : > { %s6116_s3 = sld [smem:[#allocation32_spill]] }
  0x46   : > { %s4317_s7 = scalar_lea.hbm %s6116_s3, 9216 }
  0x47   : > { %p4318_p1 = scmp.ne.s32.totalorder %s6116_s3, %s4317_s7  ;;  %p4324_p5 = scmp.lt.u32.totalorder %s4317_s7, %s6116_s3 }
  0x49   : > { %p4320_p7 = pnand %p4318_p1, %p4692_p2 }
  0x4b   : > { %p4321_p9 = pneg %p4320_p7 }
  0x4d   : > { %p4326_p6 = pnand %p4324_p5, %p4321_p9 }
  0x4f   : > { %4329 = shalt.err (!%p4326_p6)
}
  0x50   : > { %s4330_s21 = scalar_lea.vmem %s4680_s27, 9216  ;;  %p4338_p0 = scmp.lt.s32.totalorder %s4680_s27, %s4680_s27 }
  0x51   : > { %p4331_p8 = scmp.ne.s32.totalorder %s4680_s27, %s4330_s21  ;;  %p4339_p4 = scmp.lt.s32.totalorder %s4330_s21, %s4330_s21 }
  0x53   : > { %p4333_p10 = pnand %p4331_p8, %p4692_p2  ;;  %p4340_p1 = por %p4339_p4, %p4338_p0 }
  0x55   : > { %p4334_p12 = pneg %p4333_p10 }
  0x57   : > { %p4341_p7 = pnand %p4340_p1, %p4334_p12 }
  0x59   : > { %4344 = shalt.err (!%p4341_p7)
}
  0x5a   : > { %4069 = dma.hbm_to_vmem [thread:$0]  (!%p4676_p13), %s6116_s3, 9216, %s4680_s27, [#allocation7], %s6075_s24, %s6075_s24, %s6076_s15  }
  0x5b   : > { %s4345_s18 = scalar_lea.hbm %s6062_s5, 1024 }
  0x5c   : > { %p4346_p9 = scmp.ne.s32.totalorder %s6062_s5, %s4345_s18  ;;  %p4352_p8 = scmp.lt.u32.totalorder %s4345_s18, %s6062_s5 }
  0x5e   : > { %p4348_p5 = pnand %p4346_p9, %p4692_p2 }
  0x60   : > { %p4349_p6 = pneg %p4348_p5 }
  0x62   : > { %p4354_p10 = pnand %p4352_p8, %p4349_p6 }
  0x64   : > { %4357 = shalt.err (!%p4354_p10)
}
  0x65   : > { %s4358_s21 = scalar_lea.vmem %s267_s13, 1024  ;;  %p4366_p1 = scmp.lt.s32.totalorder %s267_s13, %s267_s13 }
  0x66   : > { %p4359_p12 = scmp.ne.s32.totalorder %s267_s13, %s4358_s21  ;;  %p4367_p7 = scmp.lt.s32.totalorder %s4358_s21, %s4358_s21 }
  0x68   : > { %p4361_p0 = pnand %p4359_p12, %p4692_p2  ;;  %p4368_p3 = por %p4367_p7, %p4366_p1 }
  0x6a   : > { %p4362_p4 = pneg %p4361_p0 }
  0x6c   : > { %p4369_p11 = pnand %p4368_p3, %p4362_p4 }
  0x6e   : > { %4372 = shalt.err (!%p4369_p11)
}
  0x6f   : > { %4072 = dma.hbm_to_vmem [thread:$0]  (!%p4676_p13), %s6062_s5, 1024, %s267_s13, [#allocation10], %s6075_s24, %s6075_s24, %s6076_s15  }
  0x70   : > { %s34_s17 = sadd.s32 1, %s4525_s9  ;;  %s37_s22 = sadd.s32 1, %s4529_s10 }
  0x71   : > { %p35_p3 = scmp.ge.s32.totalorder %s34_s17, 2  ;;  %s44_s4 = sadd.s32 1, %s4513_s29 }
  0x72   : > { %p51_p11 = scmp.ne.s32.totalorder %s4513_s29, %s4509_s28  ;;  %p52_p2 = scmp.eq.s32.totalorder %s4533_s11, 0 }
  0x73   : > { %s6279_s17 = smov (%p35_p3, %s34_s17), 0  ;;  %s6281_s22 = smov (!%p35_p3, %s37_s22), %s4529_s10 }
  0x74   : > { %s194_s6 = ssub.s32 %s4525_s9, %s6279_s17  ;;  %p39_p9 = scmp.ge.s32.totalorder %s6281_s22, 2 }
  0x75   : > { %p4084_p5 = scmp.lt.s32.totalorder %s4533_s11, 4  ;;  %p4776_p13 = por %p52_p2, %p51_p11 }
  0x76   : > { %s283_s8 = sand.u32 1, %s4513_s29   ;;  %s6283_s22 = smov (%p39_p9, %s6281_s22), 0 }
  0x77   : > { %s3303_s18 = sshll.u32 %s283_s8, 7  ;;  %s41_s20 = ssub.s32 %s4529_s10, %s6283_s22 }
  0x78   : > { %p42_p6 = scmp.eq.s32.totalorder %s41_s20, 0  ;;  %s195_s23 = sor.u32 %s194_s6, %s41_s20 }
  0x79   : > { %p196_p8 = scmp.eq.s32.totalorder %s195_s23, 0  ;;  %s3500_s12 = sshll.u32 %s4529_s10, 11 }
  0x7a   : > { %s4787_s7 = scalar_select %p42_p6, %s4513_s29, %s44_s4  }
  0x7b   : > { %s6118_s21 = sadd.s32 1, %s4501_s26  ;;  %s4797_s15 = scalar_lea.hbm %s6057_s0, %s3500_s12 }
  0x7c   : > { %s4792_s27 = scalar_select %p196_p8, %s4501_s26, %s6118_s21  }
  0x7d   : > { %s287_s1 = scalar_lea.vmem [#allocation3], %s3303_s18  ;;  %p4805_p10 = pnand %p4084_p5, %p4776_p13 }
  0x7e   : > { %s294_s3 = sshll.u32 %s287_s1, 4  ;;  %s4809_s6 = scalar_lea.sflag [#allocation4], %s283_s8  ;;  %s4799_s3 = int_to_ptr.vmem [resolvable:$true] %s294_s3 }
  0x7f   : > { %s4373_s24 = scalar_lea.hbm %s4797_s15, 2048  ;;  %p4375_p0 = pneg %p4805_p10 }
  0x80   : > { %p4374_p12 = scmp.ne.s32.totalorder %s4797_s15, %s4373_s24  ;;  %s4378_s13 = scalar_lea.hbm %s6057_s0, 4096 }
  0x81   : > { %p4379_p7 = scmp.lt.u32.totalorder %s4797_s15, %s6057_s0  ;;  %p4380_p3 = scmp.lt.u32.totalorder %s4378_s13, %s4373_s24 }
  0x82   : > { %p4376_p4 = pnand %p4375_p0, %p4374_p12  ;;  %p4382_p2 = scmp.lt.u32.totalorder %s4373_s24, %s4797_s15 }
  0x83   : > { %p4381_p11 = por %p4380_p3, %p4379_p7 }
  0x84   : > { %p4377_p1 = pneg %p4376_p4 }
  0x85   : > { %p4383_p9 = por %p4382_p2, %p4381_p11 }
  0x87   : > { %p4384_p5 = pnand %p4383_p9, %p4377_p1 }
  0x89   : > { %4387 = shalt.err (!%p4384_p5)
}
  0x8a   : > { %s4388_s8 = scalar_lea.vmem %s4799_s3, 2048  ;;  %s4540_s12 = smov [#allocation3]  }
  0x8b   : > { %p4389_p13 = scmp.ne.s32.totalorder %s4799_s3, %s4388_s8  ;;  %s4393_s21 = sshll.u32 %s4540_s12, 4  ;;  %s4394_s21 = int_to_ptr.vmem [resolvable:$false] %s4393_s21 }
  0x8c   : > { %s4395_s2 = scalar_lea.vmem %s4394_s21, 4096  ;;  %p4396_p12 = scmp.lt.s32.totalorder %s4799_s3, %s4394_s21 }
  0x8d   : > { %p4391_p6 = pnand %p4389_p13, %p4375_p0  ;;  %p4397_p4 = scmp.lt.s32.totalorder %s4395_s2, %s4388_s8 }
  0x8f   : > { %p4392_p8 = pneg %p4391_p6  ;;  %p4398_p7 = por %p4397_p4, %p4396_p12 }
  0x91   : > { %p4399_p3 = pnand %p4398_p7, %p4392_p8 }
  0x93   : > { %4402 = shalt.err (!%p4399_p3)
}
  0x94   : > { %s6120_s24 = smov 4   ;;  %s6121_s1 = smov 64  }
  0x95   : > { %4076 = dma.hbm_to_vmem [thread:$0]  (!%p4805_p10), %s4797_s15, 2048, %s4799_s3, %s4809_s6, %s6121_s1, %s6121_s1, %s6120_s24  }
  0x96   : > { %p6122_p0 = scmp.ne.s32.totalorder %s6112_s19, 0 }
  0x97   : > { %s308_s18 = sand.u32 (!%p6122_p0), 1, %s4509_s28   ;;  %p6123_p1 = scmp.ne.s32.totalorder (!%p6122_p0), %s6107_s16, 0 }
  0x98   : > { %306 = sbr.rel (%p6122_p0) target bundleno = 1155 (0x483), region = 48  ;;  %s3307_s13 = sshll.u32 (!%p6122_p0), %s308_s18, 7 }
  0x99   : > { %s309_s20 = scalar_lea.sflag (!%p6122_p0), [#allocation4], %s308_s18  ;;  %s4843_s23 = scalar_lea.vmem (!%p6122_p0), [#allocation3], %s3307_s13 }
  0x9f   : > { %4476 = dma.done.wait (%p6123_p1), %s309_s20, 2048  }
  0xa0   : > { %4478 = vsyncadd (%p6123_p1), %s309_s20, 4294965248  ;;  %p6124_p11 = scmp.ne.s32.totalorder %s6106_s14, 0 }
  0xa2   : > { %4480 = dma.done.wait (%p6124_p11), [#allocation7], 10240  }
  0xa3   : > { %4482 = vsyncadd (%p6124_p11), [#allocation7], 4294957056 }
  0xa4   : > { %4484 = dma.done.wait (%p6124_p11), [#allocation10], 1024  }
  0xa5   : > { %4486 = vsyncadd (%p6124_p11), [#allocation10], 4294966272  ;;  %s352_s3 = sand.u32 1, %s4497_s25   ;;  %p3312_p10 = scmp.ne.s32.totalorder %s4517_s30, 0 }
  0xa6   : > { %s3311_s19 = sshll.u32 %s352_s3, 6 }
  0xa7   : > { %s4860_s15 = scalar_lea.vmem [#allocation11], %s3311_s19  ;;  %360 = sbr.rel (%p3312_p10) target bundleno = 510 (0x1fe), region = 68 }
  0xae   : > { %v4185_v0 = vld [vmem:[#allocation6] sm:$0xff]   ;;  %v4186_v1 = vld [vmem:[#allocation6 + $0x8] sm:$0xff]   ;;  %v4187_v2 = vld [vmem:[#allocation6 + $0x10] sm:$0xff]   ;;  %v4541_v24 = vmov 0   ;;  %v753_v25 = vlaneseq  ;;  %s6127_s4 = sld [smem:[#allocation31_spill]] }
  0xaf   : > { %3919 = vmatprep.subr.bf16.mxu0 %v4185_v0  ;;  %4031 = vmatprep.subr.bf16.mxu1 %v4185_v0  ;;  %v4188_v3 = vld [vmem:[#allocation6 + $0x18] sm:$0xff]   ;;  %v4193_v4 = vld [vmem:[%s4843_s23] sm:$0xff]   ;;  %v4190_v7 = vld [vmem:[#allocation6 + $0x28] sm:$0xff]   ;;  %1556 = vst [vmem:[#allocation2] sm:$0xff] %v4541_v24 }
  0xb0   : > { %3920 = vmatpush3.bf16.msra.mxu0 %v4185_v0  ;;  %4039 = vmatpush3.bf16.msra.mxu1 %v4185_v0  ;;  %v4194_v5 = vld [vmem:[%s4843_s23 + $0x40] sm:$0xff]   ;;  %v4191_v8 = vld [vmem:[#allocation6 + $0x30] sm:$0xff]   ;;  %v4192_v9 = vld [vmem:[#allocation6 + $0x38] sm:$0xff]   ;;  %1557 = vst [vmem:[#allocation2 + $0x8] sm:$0xff] %v4541_v24  ;;  %v4879_v26 = vshrl.u32 %v753_v25, 7 }
  0xb1   : > { %3921 = vmatprep.subr.bf16.mxu0 %v4186_v1  ;;  %4032 = vmatprep.subr.bf16.mxu1 %v4186_v1  ;;  %v4189_v6 = vld [vmem:[#allocation6 + $0x20] sm:$0xff]   ;;  %v4195_v10 = vld [vmem:[%s4843_s23 + $0x8] sm:$0xff]   ;;  %v4197_v12 = vld [vmem:[%s4843_s23 + $0x10] sm:$0xff]   ;;  %1558 = vst [vmem:[#allocation2 + $0x10] sm:$0xff] %v4541_v24 }
  0xb2   : > { %3935 = vmatprep.mubr.bf16.mxu0 %v4193_v4  ;;  %3951 = vmatprep.mubr.bf16.mxu1 %v4194_v5  ;;  %v4196_v11 = vld [vmem:[%s4843_s23 + $0x48] sm:$0xff]   ;;  %v4198_v13 = vld [vmem:[%s4843_s23 + $0x50] sm:$0xff]   ;;  %v4199_v14 = vld [vmem:[%s4843_s23 + $0x18] sm:$0xff]   ;;  %1560 = vst [vmem:[#allocation2 + $0x198] sm:$0xff] %v4541_v24  ;;  %v4882_v27 = vadd.s32 8, %v4879_v26  ;;  %v4885_v28 = vadd.s32 16, %v4879_v26 }
  0xb3   : > { %v4200_v15 = vld [vmem:[%s4843_s23 + $0x58] sm:$0xff]   ;;  %v4201_v16 = vld [vmem:[%s4843_s23 + $0x20] sm:$0xff]   ;;  %v4203_v18 = vld [vmem:[%s4843_s23 + $0x28] sm:$0xff]   ;;  %1561 = vst [vmem:[#allocation2 + $0x1a0] sm:$0xff] %v4541_v24  ;;  %v4888_v29 = vadd.s32 136, %v4879_v26  ;;  %v4891_v30 = vadd.s32 144, %v4879_v26 }
  0xb4   : > { %3922 = vmatpush3.bf16.msra.mxu0 %v4186_v1  ;;  %4040 = vmatpush3.bf16.msra.mxu1 %v4186_v1  ;;  %v4202_v17 = vld [vmem:[%s4843_s23 + $0x60] sm:$0xff]   ;;  %v4204_v19 = vld [vmem:[%s4843_s23 + $0x68] sm:$0xff]   ;;  %v4205_v20 = vld [vmem:[%s4843_s23 + $0x30] sm:$0xff]   ;;  %1562 = vst [vmem:[#allocation2 + $0x1a8] sm:$0xff] %v4541_v24  ;;  %v4894_v31 = vadd.s32 24, %v4879_v26  ;;  %v4897_v32 = vadd.s32 32, %v4879_v26 }
  0xb5   : > { %3923 = vmatprep.subr.bf16.mxu0 %v4187_v2  ;;  %4033 = vmatprep.subr.bf16.mxu1 %v4187_v2  ;;  %v4206_v21 = vld [vmem:[%s4843_s23 + $0x70] sm:$0xff]   ;;  %v4207_v22 = vld [vmem:[%s4843_s23 + $0x38] sm:$0xff]   ;;  %v4900_v33 = vadd.s32 152, %v4879_v26  ;;  %v4903_v34 = vadd.s32 160, %v4879_v26  ;;  %v4906_v35 = vadd.s32 40, %v4879_v26  ;;  %v4909_v36 = vadd.s32 48, %v4879_v26 }
  0xb6   : > { %v4208_v23 = vld [vmem:[%s4843_s23 + $0x78] sm:$0xff]   ;;  %v797_v37 = vand.u32 15, %v4882_v27  ;;  %v804_v38 = vand.u32 15, %v4885_v28  ;;  %v4914_v39 = vadd.s32 168, %v4879_v26  ;;  %v909_v40 = vand.u32 15, %v4888_v29 }
  0xb7   : > { %v916_v41 = vand.u32 15, %v4891_v30  ;;  %v4924_v47 = vadd.s32 176, %v4879_v26  ;;  %v4928_v49 = vadd.s32 56, %v4879_v26  ;;  %v4931_v50 = vadd.s32 64, %v4879_v26  ;;  %v4977_v4 = vld [vmem:[%s6127_s4] ss:$0 sm:$0xff] }
  0xb8   : > { %3924 = vmatpush3.bf16.msra.mxu0 %v4187_v2  ;;  %4041 = vmatpush3.bf16.msra.mxu1 %v4187_v2  ;;  %v4934_v51 = vadd.s32 184, %v4879_v26  ;;  %v4938_v53 = vadd.s32 192, %v4879_v26  ;;  %v4941_v54 = vadd.s32 72, %v4879_v26  ;;  %v4944_v55 = vadd.s32 80, %v4879_v26 }
  0xb9   : > { %3925 = vmatprep.subr.bf16.mxu0 %v4188_v3  ;;  %4034 = vmatprep.subr.bf16.mxu1 %v4188_v3  ;;  %v4947_v56 = vadd.s32 200, %v4879_v26  ;;  %v4950_v57 = vadd.s32 208, %v4879_v26  ;;  %v4953_v58 = vadd.s32 88, %v4879_v26  ;;  %v4956_v59 = vadd.s32 96, %v4879_v26 }
  0xba   : > { %v4959_v60 = vadd.s32 216, %v4879_v26  ;;  %v4962_v61 = vadd.s32 224, %v4879_v26  ;;  %v4965_v62 = vadd.s32 120, %v4879_v26  ;;  %v4968_v63 = vadd.s32 128, %v4879_v26 }
  0xbb   : > { %6125 = vst [vmem:[#allocation20_spill] sm:$0xff] %v4956_v59  ;;  %vm1234_vm0 = vcmp.lt.s32.totalorder %v4879_v26, 1  ;;  %vm1427_vm1 = vcmp.lt.s32.totalorder %v4879_v26, 7  ;;  %v5001_v24 = vadd.s32 112, %v4879_v26  ;;  %vm5005_vm2 = vcmp.eq.s32.totalorder %v804_v38, 0 }
  0xbc   : > { %3926 = vmatpush3.bf16.msra.mxu0 %v4188_v3  ;;  %4042 = vmatpush3.bf16.msra.mxu1 %v4188_v3  ;;  %6126 = vst [vmem:[#allocation21_spill] sm:$0xff] %v4962_v61  ;;  %vm5009_vm3 = vcmp.eq.s32.totalorder %v797_v37, 15  ;;  %vm5027_vm4 = vcmp.eq.s32.totalorder %v916_v41, 0  ;;  %vm5043_vm5 = vcmp.eq.s32.totalorder %v909_v40, 15  ;;  %v6178_v59 = vand.u32 15, %v4931_v50 }
  0xbd   : > { %3927 = vmatprep.subr.bf16.mxu0 %v4189_v6  ;;  %4035 = vmatprep.subr.bf16.mxu1 %v4189_v6  ;;  %6129 = vst [vmem:[#allocation23_spill] sm:$0xff] %v5001_v24 }
  0xbe   : > { %vm5304_vm14 = vcmp.eq.s32.totalorder %v6178_v59, 0 }
  0xc0   : > { %3928 = vmatpush3.bf16.msra.mxu0 %v4189_v6  ;;  %4043 = vmatpush3.bf16.msra.mxu1 %v4189_v6 }
  0xc1   : > { %3929 = vmatprep.subr.bf16.mxu0 %v4190_v7  ;;  %4036 = vmatprep.subr.bf16.mxu1 %v4190_v7 }
  0xc4   : > { %3930 = vmatpush3.bf16.msra.mxu0 %v4190_v7  ;;  %4044 = vmatpush3.bf16.msra.mxu1 %v4190_v7 }
  0xc5   : > { %3931 = vmatprep.subr.bf16.mxu0 %v4191_v8  ;;  %4037 = vmatprep.subr.bf16.mxu1 %v4191_v8 }
  0xc8   : > { %3932 = vmatpush3.bf16.msra.mxu0 %v4191_v8  ;;  %4045 = vmatpush3.bf16.msra.mxu1 %v4191_v8  ;;  %v4983_v8 = vadd.s32 248, %v4879_v26 }
  0xc9   : > { %3933 = vmatprep.subr.bf16.mxu0 %v4192_v9  ;;  %4038 = vmatprep.subr.bf16.mxu1 %v4192_v9 }
  0xcc   : > { %3934 = vmatpush3.bf16.msra.mxu0 %v4192_v9  ;;  %4046 = vmatpush3.bf16.msra.mxu1 %v4192_v9 }
  0xcf   : > { %3936 = vmatmul.mubr.bf16.vlgmr.msra.gmra.mrb[0].mxu0 %v4195_v10  ;;  %3952 = vmatmul.mubr.bf16.vlgmr.msra.gmra.mrb[0].mxu1 %v4196_v11 }
  0xd0   : > { %3939 = vmatprep.mubr.bf16.mxu0 %v4197_v12  ;;  %3955 = vmatprep.mubr.bf16.mxu1 %v4198_v13 }
  0xd7   : > { %3940 = vmatmul.mubr.bf16.gmra.mrb[4].mxu0 %v4199_v14  ;;  %3956 = vmatmul.mubr.bf16.gmra.mrb[4].mxu1 %v4200_v15 }
  0xd8   : > { %3943 = vmatprep.mubr.bf16.mxu0 %v4201_v16  ;;  %3959 = vmatprep.mubr.bf16.mxu1 %v4202_v17 }
  0xdf   : > { %3944 = vmatmul.mubr.bf16.gmra.mrb[8].mxu0 %v4203_v18  ;;  %3960 = vmatmul.mubr.bf16.gmra.mrb[8].mxu1 %v4204_v19 }
  0xe0   : > { %3947 = vmatprep.mubr.bf16.mxu0 %v4205_v20  ;;  %3963 = vmatprep.mubr.bf16.mxu1 %v4206_v21 }
  0xe7   : > { %3948 = vmatmul.mubr.bf16.gmra.mrb[12].mxu0 %v4207_v22  ;;  %3964 = vmatmul.mubr.bf16.gmra.mrb[12].mxu1 %v4208_v23  ;;  %v4998_v23 = vadd.s32 104, %v4879_v26 }
  0xe9   : > { %6128 = vst [vmem:[#allocation22_spill] sm:$0xff] %v4998_v23 }
 0x1a2   : > { %v3937_v13 = vpop.f32.mrb[0].mxu0  ;;  %v3953_v14 = vpop.f32.mrb[0].mxu1 }
 0x1a3   : > { %v603_v19 = vadd.f32 %v3937_v13, %v4977_v4  ;;  %v667_v20 = vadd.f32 %v3953_v14, %v4977_v4  ;;  %v594_v21 = vpop.f32.mrb[1].mxu0  ;;  %v658_v22 = vpop.f32.mrb[1].mxu1 }
 0x1a4   : > { %v595_v25 = vadd.f32 %v4977_v4, %v594_v21  ;;  %v659_v27 = vadd.f32 %v4977_v4, %v658_v22  ;;  %v3938_v28 = vpop.f32.mrb[2].mxu0  ;;  %v3954_v16 = vpop.f32.mrb[2].mxu1 }
 0x1a5   : > { %v723_v18 = vmax.f32 %v603_v19, 0.0  ;;  %v5015_v15 = vmax.f32 %v667_v20, 0.0  ;;  %v606_v21 = vadd.f32 %v3938_v28, %v4977_v4  ;;  %v670_v22 = vadd.f32 %v3954_v16, %v4977_v4  ;;  %v597_v11 = vpop.f32.mrb[3].mxu0  ;;  %v661_v38 = vpop.f32.mrb[3].mxu1 }
 0x1a6   : > { %v5019_v9 = vmax.f32 %v595_v25, 0.0  ;;  %v5021_v10 = vmax.f32 %v659_v27, 0.0  ;;  %v598_v37 = vadd.f32 %v4977_v4, %v597_v11  ;;  %v662_v6 = vadd.f32 %v4977_v4, %v661_v38 }
 0x1a7   : > { %v5034_v28 = vadd.s32 232, %v4879_v26  ;;  %v5037_v25 = vadd.s32 240, %v4879_v26  ;;  %v1204_v27 = vrot.slane %v723_v18, 7  ;;  %v1397_v11 = vrot.slane %v723_v18, 1 }
 0x1a8   : > { %6134 = vst [vmem:[#allocation24_spill] sm:$0xff] %v5019_v9  ;;  %6135 = vst [vmem:[#allocation25_spill] sm:$0xff] %v5021_v10  ;;  %v1220_v38 = vrot.slane %v5015_v15, 7  ;;  %v1413_v30 = vrot.slane %v5015_v15, 1  ;;  %v6082_v20 = vrot.slane %v5019_v9, 7  ;;  %v5048_v16 = vmax.f32 %v606_v21, 0.0 }
 0x1a9   : > { %v5050_v17 = vmax.f32 %v670_v22, 0.0  ;;  %v722_v14 = vmax.f32 %v598_v37, 0.0  ;;  %v738_v1 = vmax.f32 %v662_v6, 0.0 }
 0x1aa   : > { %v3941_v2 = vpop.f32.mrb[4].mxu0  ;;  %v3957_v29 = vpop.f32.mrb[4].mxu1  ;;  %v6077_v40 = vrot.slane %v5048_v16, 7  ;;  %v6078_v52 = vrot.slane %v5048_v16, 1  ;;  %v1597_v0 = vpack.c.bf16 %v5048_v16, %v723_v18 }
 0x1ab   : > { %v6079_v21 = vrot.slane %v5050_v17, 7  ;;  %v610_v22 = vpop.f32.mrb[5].mxu0  ;;  %v674_v46 = vpop.f32.mrb[5].mxu1  ;;  %v6081_v37 = vrot.slane %v5050_v17, 1  ;;  %v1605_v48 = vpack.c.bf16 %v5050_v17, %v5015_v15  ;;  %v1203_v3 = vrot.slane %v722_v14, 7 }
 0x1ac   : > { %v1396_v5 = vrot.slane %v722_v14, 1  ;;  %v3942_v6 = vpop.f32.mrb[6].mxu0  ;;  %v5062_v44 = vpop.f32.mrb[6].mxu1  ;;  %v1263_v45 = vsel %vm1234_vm0, %v1204_v27, %v6077_v40  ;;  %v5072_v18 = vsel %vm1427_vm1, %v1397_v11, %v6078_v52  ;;  %1613 = vst [vmem:[#allocation2 + $0x38] sm:$0xff] %v1597_v0  ;;  %v1596_v7 = vpack.c.bf16 %v722_v14, %v5019_v9 }
 0x1ad   : > { %v1247_v15 = vsel %vm1234_vm0, %v1220_v38, %v6079_v21  ;;  %v613_v42 = vpop.f32.mrb[7].mxu0  ;;  %v677_v43 = vpop.f32.mrb[7].mxu1  ;;  %v5083_v40 = vsel %vm1427_vm1, %v1413_v30, %v6081_v37  ;;  %1621 = vst [vmem:[#allocation2 + $0xf8] sm:$0xff] %v1605_v48  ;;  %v1264_v52 = vsel %vm1234_vm0, %v1203_v3, %v1204_v27  ;;  %v5091_v0 = vsel %vm1234_vm0, %v6082_v20, %v1203_v3 }
 0x1ae   : > { %6140 = vst [vmem:[#allocation26_spill] sm:$0xff] %v5091_v0  ;;  %v1457_v14 = vsel %vm1427_vm1, %v1396_v5, %v1397_v11  ;;  %v6141_v21 = vand.u32 15, %v4897_v32  ;;  %v6144_v48 = vand.u32 15, %v4894_v31  ;;  %v1333_v27 = vsel %vm5005_vm2, 0.0, %v1264_v52  ;;  %1612 = vst [vmem:[#allocation2 + $0x20] sm:$0xff] %v1596_v7 }
 0x1af   : > { %v6147_v3 = vrot.slane %v5019_v9, 1  ;;  %v1525_v32 = vsel %vm5009_vm3, 0.0, %v1457_v14  ;;  %v1564_v20 = vpack.c.bf16 %v1263_v45, %v1333_v27  ;;  %v1412_v31 = vrot.slane %v738_v1, 1 }
 0x1b0   : > { %vm5097_vm6 = vcmp.eq.s32.totalorder %v6141_v21, 0  ;;  %vm5103_vm7 = vcmp.eq.s32.totalorder %v6144_v48, 15  ;;  %v1219_v21 = vrot.slane %v738_v1, 7  ;;  %v1604_v48 = vpack.c.bf16 %v738_v1, %v5021_v10 }
 0x1b1   : > { %v1458_v11 = vsel %vm1427_vm1, %v6147_v3, %v1396_v5  ;;  %v6148_v0 = vand.u32 15, %v4903_v34  ;;  %v6151_v52 = vand.u32 15, %v4900_v33  ;;  %v6154_v45 = vrot.slane %v5021_v10, 7  ;;  %1581 = vst [vmem:[#allocation2 + $0x30] sm:$0xff] %v1564_v20 }
 0x1b2   : > { %v1628_v24 = vpack.c.bf16 %v1525_v32, %v1458_v11  ;;  %v1248_v7 = vsel %vm1234_vm0, %v1219_v21, %v1220_v38  ;;  %v619_v34 = vadd.f32 %v3941_v2, %v4977_v4  ;;  %v683_v13 = vadd.f32 %v3957_v29, %v4977_v4  ;;  %1620 = vst [vmem:[#allocation2 + $0xe0] sm:$0xff] %v1604_v48  ;;  %v3945_v3 = vpop.f32.mrb[8].mxu0  ;;  %v3961_v2 = vpop.f32.mrb[8].mxu1 }
 0x1b3   : > { %vm5118_vm8 = vcmp.eq.s32.totalorder %v6148_v0, 0  ;;  %vm5124_vm9 = vcmp.eq.s32.totalorder %v6151_v52, 15  ;;  %v5134_v1 = vsel %vm1234_vm0, %v6154_v45, %v1219_v21  ;;  %v1349_v33 = vsel %vm5027_vm4, 0.0, %v1248_v7  ;;  %v626_v11 = vpop.f32.mrb[9].mxu0 }
 0x1b4   : > { %6155 = vst [vmem:[#allocation27_spill] sm:$0xff] %v5134_v1  ;;  %1644 = vst [vmem:[#allocation2 + $0x28] sm:$0xff] %v1628_v24  ;;  %v1441_v0 = vsel %vm1427_vm1, %v1412_v31, %v1413_v30  ;;  %v6156_v38 = vrot.slane %v5021_v10, 1  ;;  %v611_v27 = vadd.f32 %v4977_v4, %v610_v22  ;;  %v1572_v24 = vpack.c.bf16 %v1247_v15, %v1349_v33  ;;  %v690_v30 = vpop.f32.mrb[9].mxu1  ;;  %v5157_v22 = vpop.f32.mrb[10].mxu0 }
 0x1b5   : > { %v1541_v20 = vsel %vm5043_vm5, 0.0, %v1441_v0  ;;  %v5149_v29 = vmax.f32 %v619_v34, 0.0  ;;  %v5151_v19 = vmax.f32 %v683_v13, 0.0  ;;  %v622_v48 = vadd.f32 %v3942_v6, %v4977_v4  ;;  %v5159_v52 = vpop.f32.mrb[10].mxu1  ;;  %v5165_v34 = vpop.f32.mrb[11].mxu0 }
 0x1b6   : > { %v1442_v14 = vsel %vm1427_vm1, %v6156_v38, %v1412_v31  ;;  %v5153_v21 = vmax.f32 %v611_v27, 0.0  ;;  %v675_v31 = vadd.f32 %v4977_v4, %v674_v46  ;;  %1589 = vst [vmem:[#allocation2 + $0xf0] sm:$0xff] %v1572_v24  ;;  %v5167_v13 = vpop.f32.mrb[11].mxu1  ;;  %v6157_v38 = vand.u32 15, %v4909_v36 }
 0x1b7   : > { %v1636_v32 = vpack.c.bf16 %v1541_v20, %v1442_v14  ;;  %v6087_v41 = vrot.slane %v5149_v29, 7  ;;  %v6091_v15 = vrot.slane %v5149_v29, 1  ;;  %v5173_v0 = vmax.f32 %v622_v48, 0.0 }
 0x1b8   : > { %v1206_v46 = vrot.slane %v5153_v21, 7  ;;  %v6084_v6 = vrot.slane %v5153_v21, 1  ;;  %v5171_v33 = vmax.f32 %v675_v31, 0.0  ;;  %vm5177_vm10 = vcmp.eq.s32.totalorder %v6157_v38, 0 }
 0x1b9   : > { %1652 = vst [vmem:[#allocation2 + $0xe8] sm:$0xff] %v1636_v32  ;;  %v686_v27 = vadd.f32 %v5062_v44, %v4977_v4  ;;  %v614_v20 = vadd.f32 %v4977_v4, %v613_v42  ;;  %v6160_v24 = vand.u32 15, %v4906_v35  ;;  %v678_v31 = vadd.f32 %v4977_v4, %v677_v43 }
 0x1ba   : > { %v635_v48 = vadd.f32 %v3945_v3, %v4977_v4  ;;  %v6163_v36 = vrot.slane %v5048_v16, 7  ;;  %v6164_v44 = vrot.slane %v5048_v16, 1  ;;  %v1222_v42 = vrot.slane %v5171_v33, 7 }
 0x1bb   : > { %vm5186_vm11 = vcmp.eq.s32.totalorder %v6160_v24, 15  ;;  %v6086_v24 = vrot.slane %v5171_v33, 1  ;;  %v6165_v43 = vand.u32 15, %v4924_v47  ;;  %v6085_v16 = vrot.slane %v5173_v0, 7 }
 0x1bc   : > { %v1262_v38 = vsel %vm1234_vm0, %v6163_v36, %v1206_v46  ;;  %v1455_v35 = vsel %vm1427_vm1, %v6164_v44, %v6084_v6  ;;  %v6090_v44 = vrot.slane %v5173_v0, 1  ;;  %v6168_v6 = vand.u32 15, %v4914_v39 }
 0x1bd   : > { %vm5206_vm12 = vcmp.eq.s32.totalorder %v6165_v43, 0  ;;  %v1335_v36 = vsel %vm5097_vm6, 0.0, %v1262_v38  ;;  %v1527_v45 = vsel %vm5103_vm7, 0.0, %v1455_v35  ;;  %v6171_v43 = vrot.slane %v5050_v17, 7  ;;  %v5237_v35 = vpop.f32.mrb[12].mxu1 }
 0x1be   : > { %vm5218_vm13 = vcmp.eq.s32.totalorder %v6168_v6, 15  ;;  %v1629_v47 = vpack.c.bf16 %v1527_v45, %v5072_v18  ;;  %v6172_v37 = vrot.slane %v5050_v17, 1  ;;  %v1599_v39 = vpack.c.bf16 %v5173_v0, %v5149_v29  ;;  %v5235_v6 = vpop.f32.mrb[12].mxu0 }
 0x1bf   : > { %v1246_v23 = vsel %vm1234_vm0, %v6171_v43, %v1222_v42  ;;  %v1259_v17 = vsel %vm1234_vm0, %v6087_v41, %v6085_v16  ;;  %v5255_v43 = vsel %vm1427_vm1, %v6091_v15, %v6090_v44  ;;  %v5257_v12 = vpop.f32.mrb[13].mxu0  ;;  %v742_v16 = vmax.f32 %v678_v31, 0.0 }
 0x1c0   : > { %v1439_v38 = vsel %vm1427_vm1, %v6172_v37, %v6086_v24  ;;  %v1351_v18 = vsel %vm5118_vm8, 0.0, %v1246_v23  ;;  %v5259_v23 = vpop.f32.mrb[13].mxu1  ;;  %1645 = vst [vmem:[#allocation2 + $0x40] sm:$0xff] %v1629_v47  ;;  %1615 = vst [vmem:[#allocation2 + $0x68] sm:$0xff] %v1599_v39  ;;  %v5262_v37 = vmax.f32 %v686_v27, 0.0  ;;  %v5264_v24 = vpop.f32.mrb[14].mxu0  ;;  %v699_v44 = vadd.f32 %v3961_v2, %v4977_v4 }
 0x1c1   : > { %v1543_v45 = vsel %vm5124_vm9, 0.0, %v1439_v38  ;;  %v726_v38 = vmax.f32 %v614_v20, 0.0  ;;  %v5266_v41 = vpop.f32.mrb[14].mxu1  ;;  %v5268_v9 = vmax.f32 %v635_v48, 0.0  ;;  %v627_v15 = vadd.f32 %v4977_v4, %v626_v11  ;;  %v5273_v47 = vpop.f32.mrb[15].mxu0 }
 0x1c2   : > { %v1637_v5 = vpack.c.bf16 %v1543_v45, %v5083_v40  ;;  %v691_v1 = vadd.f32 %v4977_v4, %v690_v30  ;;  %6173 = vst [vmem:[#allocation28_spill] sm:$0xff] %v5273_v47  ;;  %v5275_v40 = vpop.f32.mrb[15].mxu1  ;;  %v6096_v27 = vrot.slane %v5262_v37, 7  ;;  %v6097_v20 = vrot.slane %v5262_v37, 1 }
 0x1c3   : > { %6174 = vst [vmem:[#allocation29_spill] sm:$0xff] %v5275_v40  ;;  %v1607_v31 = vpack.c.bf16 %v5262_v37, %v5151_v19  ;;  %v1207_v48 = vrot.slane %v726_v38, 7  ;;  %v1400_v39 = vrot.slane %v726_v38, 1  ;;  %v1598_v2 = vpack.c.bf16 %v726_v38, %v5153_v21 }
 0x1c4   : > { %1653 = vst [vmem:[#allocation2 + $0x100] sm:$0xff] %v1637_v5  ;;  %v1223_v45 = vrot.slane %v742_v16, 7  ;;  %v1416_v11 = vrot.slane %v742_v16, 1  ;;  %v6175_v30 = vrot.slane %v5151_v19, 7  ;;  %v6176_v40 = vrot.slane %v5151_v19, 1 }
 0x1c5   : > { %1623 = vst [vmem:[#allocation2 + $0x128] sm:$0xff] %v1607_v31  ;;  %v6177_v38 = vrot.slane %v5149_v29, 7  ;;  %v1261_v61 = vsel %vm1234_vm0, %v1206_v46, %v1207_v48  ;;  %v6184_v31 = vand.u32 15, %v4938_v53  ;;  %v6187_v46 = vand.u32 15, %v4934_v51  ;;  %1614 = vst [vmem:[#allocation2 + $0x50] sm:$0xff] %v1598_v2 }
 0x1c6   : > { %v1243_v5 = vsel %vm1234_vm0, %v6175_v30, %v6096_v27  ;;  %v5294_v47 = vsel %vm1427_vm1, %v6176_v40, %v6097_v20  ;;  %v6181_v27 = vand.u32 15, %v4928_v49  ;;  %v6190_v49 = vrot.slane %v5149_v29, 1 }
 0x1c7   : > { %v1260_v10 = vsel %vm1234_vm0, %v1207_v48, %v6177_v38  ;;  %vm5316_vm2 = vcmp.eq.s32.totalorder %v6184_v31, 0  ;;  %vm5322_vm3 = vcmp.eq.s32.totalorder %v6187_v46, 15  ;;  %v6191_v53 = vrot.slane %v5153_v21, 1 }
 0x1c8   : > { %vm5310_vm15 = vcmp.eq.s32.totalorder %v6181_v27, 15  ;;  %v1337_v59 = vsel %vm5177_vm10, 0.0, %v1260_v10  ;;  %v1453_v27 = vsel %vm1427_vm1, %v1400_v39, %v6190_v49  ;;  %v1565_v38 = vpack.c.bf16 %v1261_v61, %v1335_v36 }
 0x1c9   : > { %v1454_v48 = vsel %vm1427_vm1, %v6191_v53, %v1400_v39  ;;  %v1529_v51 = vsel %vm5186_vm11, 0.0, %v1453_v27  ;;  %v1566_v31 = vpack.c.bf16 %v1259_v17, %v1337_v59  ;;  %v6192_v46 = vrot.slane %v5151_v19, 7 }
 0x1ca   : > { %v1245_v29 = vsel %vm1234_vm0, %v1222_v42, %v1223_v45  ;;  %1582 = vst [vmem:[#allocation2 + $0x48] sm:$0xff] %v1565_v38  ;;  %v1630_v14 = vpack.c.bf16 %v1529_v51, %v1454_v48  ;;  %v6193_v61 = vrot.slane %v5151_v19, 1  ;;  %v6194_v36 = vrot.slane %v5171_v33, 1 }
 0x1cb   : > { %v1244_v10 = vsel %vm1234_vm0, %v1223_v45, %v6192_v46  ;;  %1583 = vst [vmem:[#allocation2 + $0x60] sm:$0xff] %v1566_v31  ;;  %v1573_v42 = vpack.c.bf16 %v1245_v29, %v1351_v18  ;;  %v1606_v45 = vpack.c.bf16 %v742_v16, %v5171_v33  ;;  %v1212_v19 = vrot.slane %v5268_v9, 7 }
 0x1cc   : > { %v1353_v21 = vsel %vm5206_vm12, 0.0, %v1244_v10  ;;  %v1437_v32 = vsel %vm1427_vm1, %v1416_v11, %v6193_v61  ;;  %v1438_v17 = vsel %vm1427_vm1, %v6194_v36, %v1416_v11  ;;  %1646 = vst [vmem:[#allocation2 + $0x58] sm:$0xff] %v1630_v14  ;;  %v1405_v59 = vrot.slane %v5268_v9, 1 }
 0x1cd   : > { %v1545_v39 = vsel %vm5218_vm13, 0.0, %v1437_v32  ;;  %v1574_v2 = vpack.c.bf16 %v1243_v5, %v1353_v21  ;;  %v5359_v49 = vmax.f32 %v699_v44, 0.0  ;;  %1590 = vst [vmem:[#allocation2 + $0x108] sm:$0xff] %v1573_v42  ;;  %1622 = vst [vmem:[#allocation2 + $0x110] sm:$0xff] %v1606_v45  ;;  %v729_v11 = vmax.f32 %v627_v15, 0.0 }
 0x1ce   : > { %v1638_v3 = vpack.c.bf16 %v1545_v39, %v1438_v17  ;;  %v5361_v27 = vmax.f32 %v691_v1, 0.0  ;;  %v638_v7 = vadd.f32 %v5157_v22, %v4977_v4  ;;  %v702_v33 = vadd.f32 %v5159_v52, %v4977_v4 }
 0x1cf   : > { %1591 = vst [vmem:[#allocation2 + $0x120] sm:$0xff] %v1574_v2  ;;  %v6195_v16 = vand.u32 15, %v4944_v55  ;;  %v6198_v44 = vand.u32 15, %v4941_v54  ;;  %v1228_v1 = vrot.slane %v5359_v49, 7  ;;  %v1421_v22 = vrot.slane %v5359_v49, 1 }
 0x1d0   : > { %1654 = vst [vmem:[#allocation2 + $0x118] sm:$0xff] %v1638_v3  ;;  %v630_v52 = vadd.f32 %v4977_v4, %v5165_v34  ;;  %v694_v55 = vadd.f32 %v4977_v4, %v5167_v13  ;;  %v6201_v15 = vand.u32 15, %v4950_v57  ;;  %v1210_v54 = vrot.slane %v729_v11, 7 }
 0x1d1   : > { %vm5369_vm4 = vcmp.eq.s32.totalorder %v6195_v16, 0  ;;  %vm5375_vm5 = vcmp.eq.s32.totalorder %v6198_v44, 15  ;;  %v1403_v48 = vrot.slane %v729_v11, 1  ;;  %v1226_v38 = vrot.slane %v5361_v27, 7 }
 0x1d2   : > { %vm5387_vm6 = vcmp.eq.s32.totalorder %v6201_v15, 0  ;;  %v1419_v51 = vrot.slane %v5361_v27, 1  ;;  %v5393_v31 = vmax.f32 %v638_v7, 0.0  ;;  %v5395_v46 = vmax.f32 %v702_v33, 0.0 }
 0x1d3   : > { %v730_v34 = vmax.f32 %v630_v52, 0.0  ;;  %v746_v10 = vmax.f32 %v694_v55, 0.0  ;;  %v6204_v13 = vrot.slane %v5173_v0, 7  ;;  %v6205_v29 = vrot.slane %v5173_v0, 1 }
 0x1d4   : > { %v6206_v21 = vrot.slane %v5262_v37, 7  ;;  %v6207_v32 = vrot.slane %v5262_v37, 1  ;;  %v6208_v2 = vand.u32 15, %v4947_v56  ;;  %v1213_v3 = vrot.slane %v5393_v31, 7 }
 0x1d5   : > { %v1258_v57 = vsel %vm1234_vm0, %v6204_v13, %v1210_v54  ;;  %v1451_v14 = vsel %vm1427_vm1, %v6205_v29, %v1403_v48  ;;  %v1406_v40 = vrot.slane %v5393_v31, 1  ;;  %v1601_v20 = vpack.c.bf16 %v5393_v31, %v5268_v9 }
 0x1d6   : > { %v1242_v61 = vsel %vm1234_vm0, %v6206_v21, %v1226_v38  ;;  %v1435_v36 = vsel %vm1427_vm1, %v6207_v32, %v1419_v51  ;;  %v1339_v17 = vsel %vm5304_vm14, 0.0, %v1258_v57  ;;  %v1531_v0 = vsel %vm5310_vm15, 0.0, %v1451_v14 }
 0x1d7   : > { %v1355_v39 = vsel %vm5316_vm2, 0.0, %v1242_v61  ;;  %v1547_v42 = vsel %vm5322_vm3, 0.0, %v1435_v36  ;;  %vm5425_vm7 = vcmp.eq.s32.totalorder %v6208_v2, 15  ;;  %v1631_v37 = vpack.c.bf16 %v1531_v0, %v5255_v43  ;;  %1617 = vst [vmem:[#allocation2 + $0x98] sm:$0xff] %v1601_v20 }
 0x1d8   : > { %v1639_v30 = vpack.c.bf16 %v1547_v42, %v5294_v47  ;;  %v1229_v50 = vrot.slane %v5395_v46, 7  ;;  %v1422_v7 = vrot.slane %v5395_v46, 1  ;;  %v1609_v56 = vpack.c.bf16 %v5395_v46, %v5359_v49  ;;  %v6246_v49 = vld [vmem:[#allocation29_spill] sm:$0xff] }
 0x1d9   : > { %1647 = vst [vmem:[#allocation2 + $0x70] sm:$0xff] %v1631_v37  ;;  %v1255_v43 = vsel %vm1234_vm0, %v1212_v19, %v1213_v3  ;;  %v5447_v47 = vsel %vm1427_vm1, %v1405_v59, %v1406_v40  ;;  %v1211_v9 = vrot.slane %v730_v34, 7  ;;  %v1404_v33 = vrot.slane %v730_v34, 1 }
 0x1da   : > { %1655 = vst [vmem:[#allocation2 + $0x130] sm:$0xff] %v1639_v30  ;;  %v1239_v16 = vsel %vm1234_vm0, %v1228_v1, %v1229_v50  ;;  %v5459_v44 = vsel %vm1427_vm1, %v1421_v22, %v1422_v7  ;;  %1625 = vst [vmem:[#allocation2 + $0x158] sm:$0xff] %v1609_v56  ;;  %v1600_v52 = vpack.c.bf16 %v730_v34, %v729_v11  ;;  %v1227_v55 = vrot.slane %v746_v10, 7 }
 0x1db   : > { %v1256_v15 = vsel %vm1234_vm0, %v1211_v9, %v1212_v19  ;;  %v1257_v13 = vsel %vm1234_vm0, %v1210_v54, %v1211_v9  ;;  %v1449_v57 = vsel %vm1427_vm1, %v1404_v33, %v1405_v59  ;;  %v1450_v29 = vsel %vm1427_vm1, %v1403_v48, %v1404_v33 }
 0x1dc   : > { %v1341_v14 = vsel %vm5369_vm4, 0.0, %v1256_v15  ;;  %v1533_v21 = vsel %vm5375_vm5, 0.0, %v1449_v57  ;;  %v1567_v11 = vpack.c.bf16 %v1257_v13, %v1339_v17  ;;  %1616 = vst [vmem:[#allocation2 + $0x80] sm:$0xff] %v1600_v52  ;;  %v1240_v19 = vsel %vm1234_vm0, %v1227_v55, %v1228_v1  ;;  %v6233_v57 = vld [vmem:[#allocation21_spill] sm:$0xff] }
 0x1dd   : > { %v6211_v34 = vand.u32 15, %v4953_v58  ;;  %v6214_v59 = vand.u32 15, %v4959_v60  ;;  %v1568_v18 = vpack.c.bf16 %v1255_v43, %v1341_v14  ;;  %v1632_v5 = vpack.c.bf16 %v1533_v21, %v1450_v29 }
 0x1de   : > { %v1241_v61 = vsel %vm1234_vm0, %v1226_v38, %v1227_v55  ;;  %v1357_v1 = vsel %vm5387_vm6, 0.0, %v1240_v19  ;;  %1584 = vst [vmem:[#allocation2 + $0x78] sm:$0xff] %v1567_v11  ;;  %v1420_v58 = vrot.slane %v746_v10, 1  ;;  %v1608_v17 = vpack.c.bf16 %v746_v10, %v5361_v27 }
 0x1df   : > { %vm5477_vm8 = vcmp.eq.s32.totalorder %v6211_v34, 15  ;;  %vm5483_vm9 = vcmp.eq.s32.totalorder %v6214_v59, 15  ;;  %v1575_v32 = vpack.c.bf16 %v1241_v61, %v1355_v39  ;;  %v1576_v36 = vpack.c.bf16 %v1239_v16, %v1357_v1  ;;  %1585 = vst [vmem:[#allocation2 + $0x90] sm:$0xff] %v1568_v18  ;;  %1648 = vst [vmem:[#allocation2 + $0x88] sm:$0xff] %v1632_v5 }
 0x1e0   : > { %v6217_v60 = vand.u32 15, %v4968_v63  ;;  %v651_v38 = vadd.f32 %v5235_v6, %v4977_v4  ;;  %v715_v53 = vadd.f32 %v5237_v35, %v4977_v4  ;;  %v643_v39 = vadd.f32 %v4977_v4, %v5257_v12  ;;  %1624 = vst [vmem:[#allocation2 + $0x140] sm:$0xff] %v1608_v17 }
 0x1e1   : > { %v707_v10 = vadd.f32 %v4977_v4, %v5259_v23  ;;  %v6220_v63 = vand.u32 15, %v4965_v62  ;;  %v1433_v6 = vsel %vm1427_vm1, %v1420_v58, %v1421_v22  ;;  %v1434_v35 = vsel %vm1427_vm1, %v1419_v51, %v1420_v58  ;;  %1592 = vst [vmem:[#allocation2 + $0x138] sm:$0xff] %v1575_v32  ;;  %1593 = vst [vmem:[#allocation2 + $0x150] sm:$0xff] %v1576_v36  ;;  %v6237_v58 = vld [vmem:[#allocation25_spill] sm:$0xff] }
 0x1e2   : > { %vm5494_vm10 = vcmp.eq.s32.totalorder %v6217_v60, 0  ;;  %v654_v62 = vadd.f32 %v5264_v24, %v4977_v4  ;;  %v718_v12 = vadd.f32 %v5266_v41, %v4977_v4  ;;  %v6223_v23 = vand.u32 15, %v4879_v26  ;;  %v6240_v60 = vld [vmem:[#allocation27_spill] sm:$0xff] }
 0x1e3   : > { %vm5508_vm11 = vcmp.eq.s32.totalorder %v6220_v63, 15  ;;  %v1549_v27 = vsel %vm5425_vm7, 0.0, %v1433_v6  ;;  %v5532_v22 = vmax.f32 %v651_v38, 0.0  ;;  %v5534_v51 = vmax.f32 %v643_v39, 0.0  ;;  %v6241_v38 = vld [vmem:[#allocation24_spill] sm:$0xff] }
 0x1e4   : > { %vm5526_vm12 = vcmp.eq.s32.totalorder %v6223_v23, 0  ;;  %v993_v2 = vand.u32 15, %v5034_v28  ;;  %v1640_v37 = vpack.c.bf16 %v1549_v27, %v1434_v35  ;;  %v5537_v24 = vmax.f32 %v707_v10, 0.0  ;;  %v6229_v28 = vld [vmem:[#allocation20_spill] sm:$0xff] }
 0x1e5   : > { %v736_v30 = vmax.f32 %v654_v62, 0.0  ;;  %v752_v41 = vmax.f32 %v718_v12, 0.0  ;;  %v6226_v20 = vand.u32 15, %v4983_v8  ;;  %v1216_v45 = vrot.slane %v5532_v22, 7  ;;  %v6243_v62 = vld [vmem:[#allocation28_spill] sm:$0xff] }
 0x1e6   : > { %v1409_v43 = vrot.slane %v5532_v22, 1  ;;  %v5547_v9 = vmax.f32 %v715_v53, 0.0  ;;  %v1000_v33 = vand.u32 15, %v5037_v25  ;;  %1656 = vst [vmem:[#allocation2 + $0x148] sm:$0xff] %v1640_v37  ;;  %v6230_v16 = vand.u32 15, %v6229_v28  ;;  %v6245_v37 = vld [vmem:[#allocation26_spill] sm:$0xff] }
 0x1e7   : > { %vm5541_vm13 = vcmp.eq.s32.totalorder %v6226_v20, 15  ;;  %v1214_v8 = vrot.slane %v5534_v51, 7  ;;  %v1407_v55 = vrot.slane %v5534_v51, 1  ;;  %v1230_v15 = vrot.slane %v5537_v24, 7 }
 0x1e8   : > { %vm5552_vm14 = vcmp.eq.s32.totalorder %v6230_v16, 0  ;;  %v1423_v13 = vrot.slane %v5537_v24, 1  ;;  %v6234_v29 = vand.u32 15, %v6233_v57  ;;  %v1217_v25 = vrot.slane %v736_v30, 7  ;;  %v6247_v16 = vld [vmem:[#allocation23_spill] sm:$0xff] }
 0x1e9   : > { %v1410_v21 = vrot.slane %v736_v30, 1  ;;  %v1603_v11 = vpack.c.bf16 %v736_v30, %v5532_v22  ;;  %v1233_v19 = vrot.slane %v752_v41, 7  ;;  %v1254_v34 = vsel %vm1234_vm0, %v1213_v3, %v1214_v8 }
 0x1ea   : > { %vm5562_vm15 = vcmp.eq.s32.totalorder %v6234_v29, 0  ;;  %v1447_v59 = vsel %vm1427_vm1, %v1406_v40, %v1407_v55  ;;  %v5585_v18 = vsel %vm1234_vm0, %v1229_v50, %v1230_v15  ;;  %v1431_v3 = vsel %vm1427_vm1, %v1422_v7, %v1423_v13 }
 0x1eb   : > { %v1232_v31 = vrot.slane %v5547_v9, 7  ;;  %v1425_v5 = vrot.slane %v5547_v9, 1  ;;  %v1535_v40 = vsel %vm5477_vm8, 0.0, %v1447_v59  ;;  %v1551_v61 = vsel %vm5483_vm9, 0.0, %v1431_v3  ;;  %1619 = vst [vmem:[#allocation2 + $0xc8] sm:$0xff] %v1603_v11 }
 0x1ec   : > { %v1633_v50 = vpack.c.bf16 %v1535_v40, %v5447_v47  ;;  %v1641_v1 = vpack.c.bf16 %v1551_v61, %v5459_v44  ;;  %v6238_v46 = vrot.slane %v6237_v58, 7  ;;  %v1251_v32 = vsel %vm1234_vm0, %v1216_v45, %v1217_v25 }
 0x1ed   : > { %v6239_v48 = vrot.slane %v6237_v58, 1  ;;  %v1444_v44 = vsel %vm1427_vm1, %v1409_v43, %v1410_v21  ;;  %v1235_v36 = vsel %vm1234_vm0, %v1232_v31, %v1233_v19  ;;  %v6242_v53 = vrot.slane %v6241_v38, 7 }
 0x1ee   : > { %v1250_v7 = vsel %vm1234_vm0, %v1217_v25, %v6238_v46  ;;  %1649 = vst [vmem:[#allocation2 + $0xa0] sm:$0xff] %v1633_v50  ;;  %1657 = vst [vmem:[#allocation2 + $0x160] sm:$0xff] %v1641_v1  ;;  %v1426_v10 = vrot.slane %v752_v41, 1  ;;  %v1611_v35 = vpack.c.bf16 %v752_v41, %v5547_v9  ;;  %v646_v12 = vadd.f32 %v4977_v4, %v6243_v62  ;;  %v6251_v25 = vld [vmem:[#allocation22_spill] sm:$0xff] }
 0x1ef   : > { %v1347_v54 = vsel %vm5494_vm10, 0.0, %v1250_v7  ;;  %v1443_v47 = vsel %vm1427_vm1, %v1410_v21, %v6239_v48  ;;  %v1266_v39 = vsel %vm1234_vm0, %v1233_v19, %v6242_v53  ;;  %v6244_v23 = vrot.slane %v6241_v38, 1 }
 0x1f0   : > { %v1539_v17 = vsel %vm5508_vm11, 0.0, %v1443_v47  ;;  %v1571_v0 = vpack.c.bf16 %v6240_v60, %v1347_v54  ;;  %v1331_v6 = vsel %vm5526_vm12, 0.0, %v1266_v39  ;;  %v1428_v42 = vsel %vm1427_vm1, %v1425_v5, %v1426_v10  ;;  %1627 = vst [vmem:[#allocation2 + $0x188] sm:$0xff] %v1611_v35 }
 0x1f1   : > { %v1635_v63 = vpack.c.bf16 %v1539_v17, %v1444_v44  ;;  %v1459_v27 = vsel %vm1427_vm1, %v1426_v10, %v6244_v23  ;;  %v1563_v30 = vpack.c.bf16 %v6245_v37, %v1331_v6  ;;  %v710_v20 = vadd.f32 %v4977_v4, %v6246_v49 }
 0x1f2   : > { %1588 = vst [vmem:[#allocation2 + $0xd8] sm:$0xff] %v1571_v0  ;;  %v1555_v41 = vsel %vm5541_vm13, 0.0, %v1459_v27  ;;  %v734_v28 = vmax.f32 %v646_v12, 0.0  ;;  %v6248_v57 = vand.u32 15, %v6247_v16  ;;  %v6252_v21 = vand.u32 15, %v6251_v25 }
 0x1f3   : > { %1651 = vst [vmem:[#allocation2 + $0xd0] sm:$0xff] %v1635_v63  ;;  %1580 = vst [vmem:[#allocation2 + $0x18] sm:$0xff] %v1563_v30  ;;  %v1643_v4 = vpack.c.bf16 %v1555_v41, %v1428_v42  ;;  %v750_v19 = vmax.f32 %v710_v20, 0.0  ;;  %vm5658_vm4 = vcmp.eq.s32.totalorder %v1000_v33, 0  ;;  %vm5662_vm5 = vcmp.eq.s32.totalorder %v993_v2, 15 }
 0x1f4   : > { %vm5648_vm2 = vcmp.eq.s32.totalorder %v6248_v57, 0  ;;  %vm5654_vm3 = vcmp.eq.s32.totalorder %v6252_v21, 15  ;;  %v1343_v3 = vsel %vm5552_vm14, 0.0, %v1254_v34  ;;  %v1215_v40 = vrot.slane %v734_v28, 7 }
 0x1f5   : > { %v1408_v61 = vrot.slane %v734_v28, 1  ;;  %v1602_v50 = vpack.c.bf16 %v734_v28, %v5534_v51  ;;  %v1359_v1 = vsel %vm5562_vm15, 0.0, %v5585_v18  ;;  %1659 = vst [vmem:[#allocation2 + $0x190] sm:$0xff] %v1643_v4  ;;  %v1231_v33 = vrot.slane %v750_v19, 7 }
 0x1f6   : > { %v1424_v58 = vrot.slane %v750_v19, 1  ;;  %v1610_v46 = vpack.c.bf16 %v750_v19, %v5537_v24  ;;  %v1252_v2 = vsel %vm1234_vm0, %v1215_v40, %v1216_v45  ;;  %v1253_v52 = vsel %vm1234_vm0, %v1214_v8, %v1215_v40 }
 0x1f7   : > { %v1445_v14 = vsel %vm1427_vm1, %v1408_v61, %v1409_v43  ;;  %v1446_v34 = vsel %vm1427_vm1, %v1407_v55, %v1408_v61  ;;  %1618 = vst [vmem:[#allocation2 + $0xb0] sm:$0xff] %v1602_v50  ;;  %v1345_v18 = vsel %vm5648_vm2, 0.0, %v1252_v2  ;;  %v1569_v7 = vpack.c.bf16 %v1253_v52, %v1343_v3 }
 0x1f8   : > { %v1537_v45 = vsel %vm5654_vm3, 0.0, %v1445_v14  ;;  %v1236_v8 = vsel %vm1234_vm0, %v1231_v33, %v1232_v31  ;;  %1626 = vst [vmem:[#allocation2 + $0x170] sm:$0xff] %v1610_v46  ;;  %v1570_v22 = vpack.c.bf16 %v1251_v32, %v1345_v18  ;;  %v1237_v51 = vsel %vm1234_vm0, %v1230_v15, %v1231_v33 }
 0x1f9   : > { %v1634_v54 = vpack.c.bf16 %v1537_v45, %v1446_v34  ;;  %v1361_v43 = vsel %vm5658_vm4, 0.0, %v1236_v8  ;;  %1586 = vst [vmem:[#allocation2 + $0xa8] sm:$0xff] %v1569_v7  ;;  %v1429_v55 = vsel %vm1427_vm1, %v1424_v58, %v1425_v5  ;;  %v1430_v31 = vsel %vm1427_vm1, %v1423_v13, %v1424_v58 }
 0x1fa   : > { %v1577_v32 = vpack.c.bf16 %v1237_v51, %v1359_v1  ;;  %v1578_v48 = vpack.c.bf16 %v1235_v36, %v1361_v43  ;;  %1587 = vst [vmem:[#allocation2 + $0xc0] sm:$0xff] %v1570_v22  ;;  %v1553_v15 = vsel %vm5662_vm5, 0.0, %v1429_v55 }
 0x1fb   : > { %1650 = vst [vmem:[#allocation2 + $0xb8] sm:$0xff] %v1634_v54  ;;  %v1642_v47 = vpack.c.bf16 %v1553_v15, %v1430_v31 }
 0x1fc   : > { %1594 = vst [vmem:[#allocation2 + $0x168] sm:$0xff] %v1577_v32  ;;  %1595 = vst [vmem:[#allocation2 + $0x180] sm:$0xff] %v1578_v48 }
 0x1fd   : > { %1658 = vst [vmem:[#allocation2 + $0x178] sm:$0xff] %v1642_v47 }
 0x1fe PF: > { %v4209_v9 = vld [vmem:[#allocation8 + $0x40] sm:$0xff]   ;;  %v4213_v26 = vld [vmem:[#allocation8 + $0x48] sm:$0xff]   ;;  %v4217_v60 = vld [vmem:[#allocation8 + $0x50] sm:$0xff]   ;;  %s3501_s6 = smul.u32 192, %s4517_s30  ;;  %s6259_s2 = sld [smem:[#allocation33_spill]] }
 0x1ff   : > { %v4210_v44 = vld [vmem:[#allocation8] sm:$0xff]   ;;  %3631 = vmatprep.subr.bf16.mxu0 %v4209_v9  ;;  %v4214_v13 = vld [vmem:[#allocation8 + $0x8] sm:$0xff]   ;;  %v4218_v0 = vld [vmem:[#allocation8 + $0x10] sm:$0xff]   ;;  %s3503_s24 = sshll.u32 %s4517_s30, 6  ;;  %s6260_s20 = sld [smem:[#allocation34_spill]] }
 0x200   : > { %v4211_v5 = vld [vmem:[#allocation8 + $0xc0] sm:$0xff]   ;;  %3632 = vmatpush3.bf16.msra.mxu0 %v4210_v44  ;;  %v4215_v36 = vld [vmem:[#allocation8 + $0xc8] sm:$0xff]   ;;  %v4219_v38 = vld [vmem:[#allocation8 + $0xd0] sm:$0xff]   ;;  %s5712_s8 = scalar_lea.vmem [#allocation2], %s3501_s6  ;;  %s5945_s1 = scalar_lea.vmem %s4843_s23, %s3503_s24 [#allocation3] }
 0x201   : > { %v4212_v24 = vld [vmem:[#allocation8 + $0x80] sm:$0xff]   ;;  %3695 = vmatprep.subr.bf16.mxu1 %v4211_v5  ;;  %3633 = vmatprep.subr.bf16.mxu0 %v4213_v26  ;;  %v4216_v17 = vld [vmem:[#allocation8 + $0x88] sm:$0xff]   ;;  %v4220_v53 = vld [vmem:[#allocation8 + $0x90] sm:$0xff]   ;;  %s6261_s23 = sld [smem:[#allocation17_spill]]  ;;  %s3520_s19 = sshll.u32 %s4517_s30, 4 }
 0x202   : > { %3696 = vmatpush3.bf16.msra.mxu1 %v4212_v24  ;;  %v4221_v39 = vld [vmem:[#allocation8 + $0x58] sm:$0xff]   ;;  %v4225_v35 = vld [vmem:[#allocation8 + $0x60] sm:$0xff]   ;;  %v4229_v23 = vld [vmem:[#allocation8 + $0x68] sm:$0xff]   ;;  %s6262_s30 = sld [smem:[#allocation18_spill]]  ;;  %s3168_s6 = sshll.u32 %s4860_s15, 4  ;;  %s5990_s6 = int_to_ptr.vmem [resolvable:$true] %s3168_s6 }
 0x203   : > { %3697 = vmatprep.subr.bf16.mxu1 %v4215_v36  ;;  %v4222_v10 = vld [vmem:[#allocation8 + $0x18] sm:$0xff]   ;;  %v4226_v62 = vld [vmem:[#allocation8 + $0x20] sm:$0xff]   ;;  %v4230_v27 = vld [vmem:[#allocation8 + $0x28] sm:$0xff]   ;;  %s6263_s21 = sld [smem:[#allocation35_spill]]  ;;  %s5996_s24 = scalar_lea.sflag [#allocation5], %s352_s3 }
 0x204   : > { %3634 = vmatpush3.bf16.msra.mxu0 %v4214_v13  ;;  %v4223_v63 = vld [vmem:[#allocation8 + $0xd8] sm:$0xff]   ;;  %v4227_v12 = vld [vmem:[#allocation8 + $0xe0] sm:$0xff]   ;;  %v4231_v37 = vld [vmem:[#allocation8 + $0xe8] sm:$0xff]   ;;  %s4542_s18 = smov [#allocation11]  }
 0x205   : > { %3635 = vmatprep.subr.bf16.mxu0 %v4217_v60  ;;  %v4224_v6 = vld [vmem:[#allocation8 + $0x98] sm:$0xff]   ;;  %v4228_v42 = vld [vmem:[#allocation8 + $0xa0] sm:$0xff]   ;;  %v4232_v30 = vld [vmem:[#allocation8 + $0xa8] sm:$0xff]   ;;  %s4407_s13 = sshll.u32 %s4542_s18, 4  ;;  %s4408_s13 = int_to_ptr.vmem [resolvable:$false] %s4407_s13 }
 0x206   : > { %3698 = vmatpush3.bf16.msra.mxu1 %v4216_v17  ;;  %v4233_v49 = vld [vmem:[#allocation8 + $0x70] sm:$0xff]   ;;  %v4237_v16 = vld [vmem:[#allocation8 + $0x78] sm:$0xff]   ;;  %v4241_v4 = vld [vmem:[#allocation8 + $0x140] sm:$0xff]   ;;  %p4410_p6 = scmp.lt.s32.totalorder %s5990_s6, %s4408_s13 }
 0x207   : > { %3699 = vmatprep.subr.bf16.mxu1 %v4219_v38  ;;  %v4234_v20 = vld [vmem:[#allocation8 + $0x30] sm:$0xff]   ;;  %v4238_v57 = vld [vmem:[#allocation8 + $0x38] sm:$0xff]   ;;  %v3343_v19 = vld [vmem:[%s5712_s8 + $0x18] sm:$0xff]  ;;  %s3496_s14 = sshll.u32 %s6261_s23, 5 }
 0x208   : > { %3636 = vmatpush3.bf16.msra.mxu0 %v4218_v0  ;;  %v4235_v41 = vld [vmem:[#allocation8 + $0xf0] sm:$0xff]   ;;  %v4239_v29 = vld [vmem:[#allocation8 + $0xf8] sm:$0xff]   ;;  %v4242_v56 = vld [vmem:[#allocation8 + $0x100] sm:$0xff]   ;;  %2456 = vmatprep.mubr.bf16.mxu1 %v3343_v19  ;;  %s3165_s16 = sadd.s32 %s3520_s19, %s3496_s14  ;;  %p6264_p9 = scmp.ne.s32.totalorder %s6262_s30, 0 }
 0x209   : > { %3637 = vmatprep.subr.bf16.mxu0 %v4221_v39  ;;  %v4236_v28 = vld [vmem:[#allocation8 + $0xb0] sm:$0xff]   ;;  %v1665_v25 = vld [vmem:[%s5712_s8 + $0x8] sm:$0xff]  ;;  %v1666_v59 = vld [vmem:[%s5712_s8 + $0x10] sm:$0xff]  ;;  %s3497_s4 = sshll.u32 %s3165_s16, 6 }
 0x20a   : > { %3700 = vmatpush3.bf16.msra.mxu1 %v4220_v53  ;;  %2359 = vmatprep.mubr.bf16.mxu0 %v1665_v25  ;;  %v4240_v21 = vld [vmem:[#allocation8 + $0xb8] sm:$0xff]   ;;  %v1664_v11 = vld [vmem:[%s5712_s8] sm:$0xff]  ;;  %v4243_v40 = vld [vmem:[#allocation8 + $0x148] sm:$0xff]  }
 0x20b   : > { %3701 = vmatprep.subr.bf16.mxu1 %v4223_v63  ;;  %v5719_v3 = vld [vmem:[%s5712_s8 + $0x20] sm:$0xff]  ;;  %v5723_v61 = vld [vmem:[%s5712_s8 + $0x30] sm:$0xff]  ;;  %v4244_v50 = vld [vmem:[#allocation8 + $0x108] sm:$0xff]  }
 0x20c   : > { %3638 = vmatpush3.bf16.msra.mxu0 %v4222_v10  ;;  %v5727_v1 = vld [vmem:[%s5712_s8 + $0x38] sm:$0xff]  ;;  %v4245_v33 = vld [vmem:[#allocation8 + $0x150] sm:$0xff]   ;;  %v5730_v46 = vld [vmem:[%s5712_s8 + $0x28] sm:$0xff] }
 0x20d   : > { %3639 = vmatprep.subr.bf16.mxu0 %v4225_v35  ;;  %v4246_v58 = vld [vmem:[#allocation8 + $0x110] sm:$0xff]   ;;  %v4247_v2 = vld [vmem:[#allocation8 + $0x158] sm:$0xff]   ;;  %v4249_v34 = vld [vmem:[#allocation8 + $0x1c0] sm:$0xff]  }
 0x20e   : > { %3702 = vmatpush3.bf16.msra.mxu1 %v4224_v6  ;;  %v5734_v52 = vld [vmem:[%s5712_s8 + $0x48] sm:$0xff]  ;;  %v4250_v18 = vld [vmem:[#allocation8 + $0x180] sm:$0xff]   ;;  %v5742_v22 = vld [vmem:[%s5712_s8 + $0x40] sm:$0xff] }
 0x20f   : > { %3703 = vmatprep.subr.bf16.mxu1 %v4227_v12  ;;  %v4248_v14 = vld [vmem:[#allocation8 + $0x118] sm:$0xff]   ;;  %v5739_v45 = vld [vmem:[%s5712_s8 + $0x50] sm:$0xff]  ;;  %v4253_v54 = vld [vmem:[#allocation8 + $0x1c8] sm:$0xff]  }
 0x210   : > { %3640 = vmatpush3.bf16.msra.mxu0 %v4226_v62  ;;  %v4251_v7 = vld [vmem:[#allocation8 + $0x160] sm:$0xff]   ;;  %v5747_v51 = vld [vmem:[%s5712_s8 + $0x60] sm:$0xff]  ;;  %v4254_v43 = vld [vmem:[#allocation8 + $0x188] sm:$0xff]  }
 0x211   : > { %3641 = vmatprep.subr.bf16.mxu0 %v4229_v23  ;;  %v4252_v8 = vld [vmem:[#allocation8 + $0x120] sm:$0xff]   ;;  %v4255_v55 = vld [vmem:[#allocation8 + $0x168] sm:$0xff]   ;;  %v5752_v32 = vld [vmem:[%s5712_s8 + $0x68] sm:$0xff] }
 0x212   : > { %3704 = vmatpush3.bf16.msra.mxu1 %v4228_v42  ;;  %v4256_v31 = vld [vmem:[#allocation8 + $0x128] sm:$0xff]   ;;  %v4257_v48 = vld [vmem:[#allocation8 + $0x1d0] sm:$0xff]   ;;  %v4259_v9 = vld [vmem:[#allocation8 + $0x1d8] sm:$0xff]  }
 0x213   : > { %3705 = vmatprep.subr.bf16.mxu1 %v4231_v37  ;;  %v4258_v15 = vld [vmem:[#allocation8 + $0x190] sm:$0xff]   ;;  %v5755_v47 = vld [vmem:[%s5712_s8 + $0x58] sm:$0xff]  ;;  %v4260_v44 = vld [vmem:[#allocation8 + $0x198] sm:$0xff]  }
 0x214   : > { %3642 = vmatpush3.bf16.msra.mxu0 %v4230_v27  ;;  %v5760_v5 = vld [vmem:[%s5712_s8 + $0x78] sm:$0xff]  ;;  %v4261_v24 = vld [vmem:[#allocation8 + $0x170] sm:$0xff]   ;;  %v4263_v13 = vld [vmem:[#allocation8 + $0x1e0] sm:$0xff]  }
 0x215   : > { %3643 = vmatprep.subr.bf16.mxu0 %v4233_v49  ;;  %v4262_v26 = vld [vmem:[#allocation8 + $0x130] sm:$0xff]   ;;  %v4264_v36 = vld [vmem:[#allocation8 + $0x1a0] sm:$0xff]   ;;  %v4265_v0 = vld [vmem:[#allocation8 + $0x1e8] sm:$0xff]  }
 0x216   : > { %3706 = vmatpush3.bf16.msra.mxu1 %v4232_v30  ;;  %v5765_v17 = vld [vmem:[%s5712_s8 + $0x70] sm:$0xff]  ;;  %v5768_v60 = vld [vmem:[%s5712_s8 + $0x80] sm:$0xff]  ;;  %v4266_v53 = vld [vmem:[#allocation8 + $0x1a8] sm:$0xff]  }
 0x217   : > { %3707 = vmatprep.subr.bf16.mxu1 %v4235_v41  ;;  %v5771_v38 = vld [vmem:[%s5712_s8 + $0x90] sm:$0xff]  ;;  %v4267_v39 = vld [vmem:[#allocation8 + $0x178] sm:$0xff]   ;;  %v4269_v63 = vld [vmem:[#allocation8 + $0x1f0] sm:$0xff]  }
 0x218   : > { %3644 = vmatpush3.bf16.msra.mxu0 %v4234_v20  ;;  %v4268_v10 = vld [vmem:[#allocation8 + $0x138] sm:$0xff]   ;;  %v4270_v6 = vld [vmem:[#allocation8 + $0x1b0] sm:$0xff]   ;;  %v5781_v12 = vld [vmem:[%s5712_s8 + $0x98] sm:$0xff] }
 0x219   : > { %3645 = vmatprep.subr.bf16.mxu0 %v4237_v16  ;;  %v4271_v35 = vld [vmem:[#allocation8 + $0x1f8] sm:$0xff]   ;;  %v4273_v42 = vld [vmem:[#allocation8 + $0x200] sm:$0xff]   ;;  %v5789_v30 = vld [vmem:[%s5712_s8 + $0xa0] sm:$0xff] }
 0x21a   : > { %3708 = vmatpush3.bf16.msra.mxu1 %v4236_v28  ;;  %v5778_v62 = vld [vmem:[%s5712_s8 + $0x88] sm:$0xff]  ;;  %v1686_v37 = vld [vmem:[%s5712_s8 + $0xb0] sm:$0xff]  ;;  %v3364_v49 = vld [vmem:[%s5712_s8 + $0xc0] sm:$0xff] }
 0x21b   : > { %3709 = vmatprep.subr.bf16.mxu1 %v4239_v29  ;;  %v4272_v23 = vld [vmem:[#allocation8 + $0x1b8] sm:$0xff]   ;;  %v5795_v20 = vld [vmem:[%s5712_s8 + $0xb8] sm:$0xff]  ;;  %v4275_v28 = vld [vmem:[#allocation8 + $0x210] sm:$0xff]  }
 0x21c   : > { %3646 = vmatpush3.bf16.msra.mxu0 %v4238_v57  ;;  %v3361_v27 = vld [vmem:[%s5712_s8 + $0xa8] sm:$0xff]  ;;  %v4274_v41 = vld [vmem:[#allocation8 + $0x208] sm:$0xff]   ;;  %v4277_v57 = vld [vmem:[#allocation8 + $0x220] sm:$0xff]  }
 0x21d   : > { %3759 = vmatprep.subr.bf16.mxu0 %v4241_v4  ;;  %v4276_v16 = vld [vmem:[#allocation8 + $0x218] sm:$0xff]   ;;  %v4278_v29 = vld [vmem:[#allocation8 + $0x228] sm:$0xff]   ;;  %v4279_v25 = vld [vmem:[#allocation8 + $0x230] sm:$0xff]  }
 0x21e   : > { %3710 = vmatpush3.bf16.msra.mxu1 %v4240_v21  ;;  %v4280_v21 = vld [vmem:[#allocation8 + $0x238] sm:$0xff]   ;;  %v3366_v4 = vld [vmem:[%s5712_s8 + $0xd0] sm:$0xff] }
 0x21f   : > { %2360 = vmatmul.mubr.bf16.vlgmr.msra.gmra.mrb[0].mxu0 %v1664_v11  ;;  %3823 = vmatprep.subr.bf16.mxu1 %v4249_v34  ;;  %v3388_v11 = vld [vmem:[%s5712_s8 + $0xc8] sm:$0xff] }
 0x220   : > { %3760 = vmatpush3.bf16.msra.mxu0 %v4242_v56  ;;  %2367 = vmatprep.mubr.bf16.mxu0 %v5719_v3  ;;  %v3390_v56 = vld [vmem:[%s5712_s8 + $0xd8] sm:$0xff] }
 0x221   : > { %2457 = vmatmul.mubr.bf16.vlgmr.msra.gmra.mrb[0].mxu1 %v1666_v59  ;;  %3761 = vmatprep.subr.bf16.mxu0 %v4243_v40  ;;  %v3392_v59 = vld [vmem:[%s5712_s8 + $0xe8] sm:$0xff]  ;;  %v4282_v40 = vld [vmem:[#allocation9 + $0x8] sm:$0xff]  }
 0x222   : > { %2464 = vmatprep.mubr.bf16.mxu1 %v5723_v61  ;;  %3824 = vmatpush3.bf16.msra.mxu1 %v4250_v18 }
 0x223   : > { %3825 = vmatprep.subr.bf16.mxu1 %v4253_v54 }
 0x224   : > { %3762 = vmatpush3.bf16.msra.mxu0 %v4244_v50  ;;  %v4284_v50 = vld [vmem:[#allocation9 + $0x18] sm:$0xff]  }
 0x225   : > { %3763 = vmatprep.subr.bf16.mxu0 %v4245_v33  ;;  %v4286_v33 = vld [vmem:[#allocation9 + $0x28] sm:$0xff]  }
 0x226   : > { %3826 = vmatpush3.bf16.msra.mxu1 %v4254_v43 }
 0x227   : > { %2368 = vmatmul.mubr.bf16.gmra.mrb[4].mxu0 %v3343_v19  ;;  %3827 = vmatprep.subr.bf16.mxu1 %v4257_v48  ;;  %v3391_v19 = vld [vmem:[%s5712_s8 + $0xe0] sm:$0xff] }
 0x228   : > { %2375 = vmatprep.mubr.bf16.mxu0 %v5727_v1  ;;  %3764 = vmatpush3.bf16.msra.mxu0 %v4246_v58  ;;  %v4287_v58 = vld [vmem:[#allocation9 + $0x30] sm:$0xff]  }
 0x229   : > { %2465 = vmatmul.mubr.bf16.gmra.mrb[4].mxu1 %v5730_v46  ;;  %3765 = vmatprep.subr.bf16.mxu0 %v4247_v2  ;;  %v5835_v2 = vld [vmem:[%s6259_s2] ss:$0 sm:$0xff]  ;;  %s5988_s2 = scalar_lea.hbm %s6263_s21, %s3497_s4 }
 0x22a   : > { %2472 = vmatprep.mubr.bf16.mxu1 %v5734_v52  ;;  %3828 = vmatpush3.bf16.msra.mxu1 %v4258_v15 }
 0x22b   : > { %3829 = vmatprep.subr.bf16.mxu1 %v4259_v9 }
 0x22c   : > { %3766 = vmatpush3.bf16.msra.mxu0 %v4248_v14 }
 0x22d   : > { %3767 = vmatprep.subr.bf16.mxu0 %v4251_v7 }
 0x22e   : > { %3830 = vmatpush3.bf16.msra.mxu1 %v4260_v44 }
 0x22f   : > { %2376 = vmatmul.mubr.bf16.gmra.mrb[8].mxu0 %v5723_v61  ;;  %3831 = vmatprep.subr.bf16.mxu1 %v4263_v13 }
 0x230   : > { %2383 = vmatprep.mubr.bf16.mxu0 %v5739_v45  ;;  %3768 = vmatpush3.bf16.msra.mxu0 %v4252_v8 }
 0x231   : > { %2473 = vmatmul.mubr.bf16.gmra.mrb[8].mxu1 %v5742_v22  ;;  %3769 = vmatprep.subr.bf16.mxu0 %v4255_v55 }
 0x232   : > { %2480 = vmatprep.mubr.bf16.mxu1 %v5747_v51  ;;  %3832 = vmatpush3.bf16.msra.mxu1 %v4264_v36 }
 0x233   : > { %3833 = vmatprep.subr.bf16.mxu1 %v4265_v0 }
 0x234   : > { %3770 = vmatpush3.bf16.msra.mxu0 %v4256_v31  ;;  %v4288_v31 = vld [vmem:[#allocation9 + $0x38] sm:$0xff]  }
 0x235   : > { %3771 = vmatprep.subr.bf16.mxu0 %v4261_v24 }
 0x236   : > { %3834 = vmatpush3.bf16.msra.mxu1 %v4266_v53 }
 0x237   : > { %2384 = vmatmul.mubr.bf16.gmra.mrb[12].mxu0 %v5734_v52  ;;  %3835 = vmatprep.subr.bf16.mxu1 %v4269_v63 }
 0x238   : > { %2391 = vmatprep.mubr.bf16.mxu0 %v5752_v32  ;;  %3772 = vmatpush3.bf16.msra.mxu0 %v4262_v26 }
 0x239   : > { %2481 = vmatmul.mubr.bf16.gmra.mrb[12].mxu1 %v5755_v47  ;;  %3773 = vmatprep.subr.bf16.mxu0 %v4267_v39 }
 0x23a   : > { %2488 = vmatprep.mubr.bf16.mxu1 %v5760_v5  ;;  %3836 = vmatpush3.bf16.msra.mxu1 %v4270_v6 }
 0x23b   : > { %3837 = vmatprep.subr.bf16.mxu1 %v4271_v35 }
 0x23c   : > { %3774 = vmatpush3.bf16.msra.mxu0 %v4268_v10 }
 0x23d   : > { %3967 = vmatprep.subr.bf16.mxu0 %v4273_v42 }
 0x23e   : > { %3838 = vmatpush3.bf16.msra.mxu1 %v4272_v23 }
 0x23f   : > { %2392 = vmatmul.mubr.bf16.gmra.mrb[16].mxu0 %v5747_v51 }
 0x240   : > { %2399 = vmatprep.mubr.bf16.mxu0 %v5768_v60 }
 0x241   : > { %2489 = vmatmul.mubr.bf16.gmra.mrb[16].mxu1 %v5765_v17 }
 0x242   : > { %2496 = vmatprep.mubr.bf16.mxu1 %v5771_v38 }
 0x247   : > { %2400 = vmatmul.mubr.bf16.gmra.mrb[20].mxu0 %v5760_v5 }
 0x248   : > { %2407 = vmatprep.mubr.bf16.mxu0 %v5781_v12 }
 0x249   : > { %2497 = vmatmul.mubr.bf16.gmra.mrb[20].mxu1 %v5778_v62 }
 0x24a   : > { %2504 = vmatprep.mubr.bf16.mxu1 %v3361_v27 }
 0x24f   : > { %2408 = vmatmul.mubr.bf16.gmra.mrb[24].mxu0 %v5771_v38 }
 0x250   : > { %2415 = vmatprep.mubr.bf16.mxu0 %v1686_v37 }
 0x251   : > { %2505 = vmatmul.mubr.bf16.gmra.mrb[24].mxu1 %v5789_v30 }
 0x252   : > { %2512 = vmatprep.mubr.bf16.mxu1 %v3364_v49 }
 0x257   : > { %2416 = vmatmul.mubr.bf16.gmra.mrb[28].mxu0 %v3361_v27 }
 0x258   : > { %2553 = vmatprep.mubr.bf16.mxu0 %v5730_v46 }
 0x259   : > { %2513 = vmatmul.mubr.bf16.gmra.mrb[28].mxu1 %v5795_v20 }
 0x25a   : > { %2650 = vmatprep.mubr.bf16.mxu1 %v5727_v1 }
 0x25f   : > { %2554 = vmatmul.mubr.bf16.vlgmr.msra.gmra.mrb[32].mxu0 %v5719_v3  ;;  %v4281_v3 = vld [vmem:[#allocation9] sm:$0xff]  }
 0x260   : > { %3968 = vmatpush3.bf16.msra.mxu0 %v4273_v42  ;;  %2561 = vmatprep.mubr.bf16.mxu0 %v5742_v22 }
 0x261   : > { %3969 = vmatprep.subr.bf16.mxu0 %v4274_v41  ;;  %2651 = vmatmul.mubr.bf16.vlgmr.msra.gmra.mrb[32].mxu1 %v5723_v61  ;;  %v4283_v61 = vld [vmem:[#allocation9 + $0x10] sm:$0xff]  }
 0x262   : > { %2658 = vmatprep.mubr.bf16.mxu1 %v5739_v45  ;;  %3999 = vmatprep.subr.bf16.mxu1 %v4281_v3 }
 0x263   : > { %4000 = vmatpush3.bf16.msra.mxu1 %v4281_v3 }
 0x264   : > { %3970 = vmatpush3.bf16.msra.mxu0 %v4274_v41  ;;  %4001 = vmatprep.subr.bf16.mxu1 %v4282_v40 }
 0x265   : > { %3971 = vmatprep.subr.bf16.mxu0 %v4275_v28 }
 0x267   : > { %2562 = vmatmul.mubr.bf16.gmra.mrb[36].mxu0 %v5727_v1  ;;  %4002 = vmatpush3.bf16.msra.mxu1 %v4282_v40  ;;  %v4285_v1 = vld [vmem:[#allocation9 + $0x20] sm:$0xff]  }
 0x268   : > { %2569 = vmatprep.mubr.bf16.mxu0 %v5755_v47  ;;  %3972 = vmatpush3.bf16.msra.mxu0 %v4275_v28 }
 0x269   : > { %3973 = vmatprep.subr.bf16.mxu0 %v4276_v16  ;;  %2659 = vmatmul.mubr.bf16.gmra.mrb[36].mxu1 %v5734_v52 }
 0x26a   : > { %2666 = vmatprep.mubr.bf16.mxu1 %v5752_v32  ;;  %4003 = vmatprep.subr.bf16.mxu1 %v4283_v61 }
 0x26b   : > { %4004 = vmatpush3.bf16.msra.mxu1 %v4283_v61 }
 0x26c   : > { %3974 = vmatpush3.bf16.msra.mxu0 %v4276_v16  ;;  %4005 = vmatprep.subr.bf16.mxu1 %v4284_v50 }
 0x26d   : > { %3975 = vmatprep.subr.bf16.mxu0 %v4277_v57 }
 0x26f   : > { %2570 = vmatmul.mubr.bf16.gmra.mrb[40].mxu0 %v5739_v45  ;;  %4006 = vmatpush3.bf16.msra.mxu1 %v4284_v50 }
 0x270   : > { %2577 = vmatprep.mubr.bf16.mxu0 %v5765_v17  ;;  %3976 = vmatpush3.bf16.msra.mxu0 %v4277_v57 }
 0x271   : > { %3977 = vmatprep.subr.bf16.mxu0 %v4278_v29  ;;  %2667 = vmatmul.mubr.bf16.gmra.mrb[40].mxu1 %v5747_v51 }
 0x272   : > { %2674 = vmatprep.mubr.bf16.mxu1 %v5768_v60  ;;  %4007 = vmatprep.subr.bf16.mxu1 %v4285_v1 }
 0x273   : > { %4008 = vmatpush3.bf16.msra.mxu1 %v4285_v1 }
 0x274   : > { %3978 = vmatpush3.bf16.msra.mxu0 %v4278_v29  ;;  %4009 = vmatprep.subr.bf16.mxu1 %v4286_v33 }
 0x275   : > { %3979 = vmatprep.subr.bf16.mxu0 %v4279_v25 }
 0x277   : > { %2578 = vmatmul.mubr.bf16.gmra.mrb[44].mxu0 %v5752_v32  ;;  %4010 = vmatpush3.bf16.msra.mxu1 %v4286_v33 }
 0x278   : > { %2585 = vmatprep.mubr.bf16.mxu0 %v5778_v62  ;;  %3980 = vmatpush3.bf16.msra.mxu0 %v4279_v25 }
 0x279   : > { %3981 = vmatprep.subr.bf16.mxu0 %v4280_v21  ;;  %2675 = vmatmul.mubr.bf16.gmra.mrb[44].mxu1 %v5760_v5 }
 0x27a   : > { %2682 = vmatprep.mubr.bf16.mxu1 %v5781_v12  ;;  %4011 = vmatprep.subr.bf16.mxu1 %v4287_v58 }
 0x27b   : > { %4012 = vmatpush3.bf16.msra.mxu1 %v4287_v58 }
 0x27c   : > { %3982 = vmatpush3.bf16.msra.mxu0 %v4280_v21  ;;  %4013 = vmatprep.subr.bf16.mxu1 %v4288_v31 }
 0x27f   : > { %2586 = vmatmul.mubr.bf16.gmra.mrb[48].mxu0 %v5768_v60  ;;  %4014 = vmatpush3.bf16.msra.mxu1 %v4288_v31 }
 0x280   : > { %2593 = vmatprep.mubr.bf16.mxu0 %v5789_v30 }
 0x281   : > { %2683 = vmatmul.mubr.bf16.gmra.mrb[48].mxu1 %v5771_v38 }
 0x282   : > { %2690 = vmatprep.mubr.bf16.mxu1 %v1686_v37 }
 0x287   : > { %2594 = vmatmul.mubr.bf16.gmra.mrb[52].mxu0 %v5781_v12 }
 0x288   : > { %2601 = vmatprep.mubr.bf16.mxu0 %v5795_v20 }
 0x289   : > { %2691 = vmatmul.mubr.bf16.gmra.mrb[52].mxu1 %v3361_v27 }
 0x28a   : > { %2698 = vmatprep.mubr.bf16.mxu1 %v3388_v11 }
 0x28f   : > { %2602 = vmatmul.mubr.bf16.gmra.mrb[56].mxu0 %v1686_v37 }
 0x290   : > { %2609 = vmatprep.mubr.bf16.mxu0 %v3366_v4 }
 0x291   : > { %2699 = vmatmul.mubr.bf16.gmra.mrb[56].mxu1 %v3364_v49 }
 0x292   : > { %2706 = vmatprep.mubr.bf16.mxu1 %v3391_v19 }
 0x297   : > { %2610 = vmatmul.mubr.bf16.gmra.mrb[60].mxu0 %v3388_v11 }
 0x298   : > { %3983 = vmatprep.mubr.bf16.mxu0 %v5742_v22 }
 0x299   : > { %2707 = vmatmul.mubr.bf16.gmra.mrb[60].mxu1 %v3390_v56 }
 0x29f   : > { %3984 = vmatmul.mubr.bf16.vlgmr.msra.gmra.mrb[64].mxu0 %v5755_v47 }
 0x2a0   : > { %3987 = vmatprep.mubr.bf16.mxu0 %v5765_v17 }
 0x2a7   : > { %3988 = vmatmul.mubr.bf16.gmra.mrb[68].mxu0 %v5778_v62 }
 0x2a8   : > { %3991 = vmatprep.mubr.bf16.mxu0 %v5789_v30 }
 0x2af   : > { %3992 = vmatmul.mubr.bf16.gmra.mrb[72].mxu0 %v5795_v20 }
 0x2b0   : > { %3995 = vmatprep.mubr.bf16.mxu0 %v3366_v4 }
 0x2b7   : > { %3996 = vmatmul.mubr.bf16.gmra.mrb[76].mxu0 %v3392_v59 }
 0x2f2   : > { %v3647_v46 = vpop.f32.mrb[0].mxu0 }
 0x2f3   : > { %v3648_v52 = vpop.f32.mrb[1].mxu0 }
 0x2f4   : > { %v3649_v14 = vadd.f32 %v3648_v52, %v3647_v46  ;;  %v3650_v34 = vpop.f32.mrb[2].mxu0  ;;  %v3711_v18 = vpop.f32.mrb[0].mxu1 }
 0x2f5   : > { %v3651_v45 = vpop.f32.mrb[3].mxu0  ;;  %v3712_v22 = vpop.f32.mrb[1].mxu1 }
 0x2f6   : > { %v2362_v7 = vadd.f32 %v3649_v14, %v5835_v2  ;;  %v3652_v8 = vadd.f32 %v3651_v45, %v3650_v34  ;;  %v3713_v54 = vadd.f32 %v3712_v22, %v3711_v18  ;;  %v3714_v51 = vpop.f32.mrb[2].mxu1 }
 0x2f7   : > { %v3715_v55 = vpop.f32.mrb[3].mxu1 }
 0x2f8   : > { %v2365_v43 = vadd.f32 %v3652_v8, %v5835_v2  ;;  %v5839_v32 = vadd.f32 %v3713_v54, %v2362_v7  ;;  %v3716_v48 = vadd.f32 %v3715_v55, %v3714_v51 }
 0x2fa   : > { %v3653_v15 = vpop.f32.mrb[4].mxu0  ;;  %v5841_v47 = vadd.f32 %v3716_v48, %v2365_v43 }
 0x2fb   : > { %v3654_v9 = vpop.f32.mrb[5].mxu0 }
 0x2fc   : > { %v3655_v44 = vadd.f32 %v3654_v9, %v3653_v15  ;;  %v3656_v5 = vpop.f32.mrb[6].mxu0  ;;  %v3717_v24 = vpop.f32.mrb[4].mxu1 }
 0x2fd   : > { %v3657_v26 = vpop.f32.mrb[7].mxu0  ;;  %v3718_v17 = vpop.f32.mrb[5].mxu1 }
 0x2fe   : > { %v2370_v13 = vadd.f32 %v3655_v44, %v5835_v2  ;;  %v3658_v36 = vadd.f32 %v3657_v26, %v3656_v5  ;;  %v3719_v60 = vadd.f32 %v3718_v17, %v3717_v24  ;;  %v3720_v0 = vpop.f32.mrb[6].mxu1 }
 0x2ff   : > { %v3721_v53 = vpop.f32.mrb[7].mxu1 }
 0x300   : > { %v2373_v38 = vadd.f32 %v3658_v36, %v5835_v2  ;;  %v5845_v39 = vadd.f32 %v3719_v60, %v2370_v13  ;;  %v3722_v10 = vadd.f32 %v3721_v53, %v3720_v0 }
 0x302   : > { %v3659_v63 = vpop.f32.mrb[8].mxu0  ;;  %v5847_v6 = vadd.f32 %v3722_v10, %v2373_v38 }
 0x303   : > { %v3660_v35 = vpop.f32.mrb[9].mxu0 }
 0x304   : > { %v3661_v62 = vadd.f32 %v3660_v35, %v3659_v63  ;;  %v3662_v12 = vpop.f32.mrb[10].mxu0  ;;  %v3723_v42 = vpop.f32.mrb[8].mxu1 }
 0x305   : > { %v3663_v23 = vpop.f32.mrb[11].mxu0  ;;  %v3724_v30 = vpop.f32.mrb[9].mxu1 }
 0x306   : > { %v2378_v27 = vadd.f32 %v3661_v62, %v5835_v2  ;;  %v3664_v37 = vadd.f32 %v3663_v23, %v3662_v12  ;;  %v3725_v49 = vadd.f32 %v3724_v30, %v3723_v42  ;;  %v3726_v20 = vpop.f32.mrb[10].mxu1 }
 0x307   : > { %v3727_v28 = vpop.f32.mrb[11].mxu1 }
 0x308   : > { %v2381_v41 = vadd.f32 %v3664_v37, %v5835_v2  ;;  %v5851_v16 = vadd.f32 %v3725_v49, %v2378_v27  ;;  %v3728_v57 = vadd.f32 %v3727_v28, %v3726_v20 }
 0x30a   : > { %v3665_v29 = vpop.f32.mrb[12].mxu0  ;;  %v5853_v25 = vadd.f32 %v3728_v57, %v2381_v41 }
 0x30b   : > { %v3666_v21 = vpop.f32.mrb[13].mxu0 }
 0x30c   : > { %v3667_v11 = vadd.f32 %v3666_v21, %v3665_v29  ;;  %v3668_v4 = vpop.f32.mrb[14].mxu0  ;;  %v3729_v19 = vpop.f32.mrb[12].mxu1 }
 0x30d   : > { %v3669_v56 = vpop.f32.mrb[15].mxu0  ;;  %v3730_v40 = vpop.f32.mrb[13].mxu1 }
 0x30e   : > { %v2386_v59 = vadd.f32 %v3667_v11, %v5835_v2  ;;  %v3670_v3 = vadd.f32 %v3669_v56, %v3668_v4  ;;  %v3731_v61 = vadd.f32 %v3730_v40, %v3729_v19  ;;  %v3732_v50 = vpop.f32.mrb[14].mxu1 }
 0x30f   : > { %v3733_v33 = vpop.f32.mrb[15].mxu1 }
 0x310   : > { %v2389_v1 = vadd.f32 %v3670_v3, %v5835_v2  ;;  %v5857_v58 = vadd.f32 %v3731_v61, %v2386_v59  ;;  %v3734_v46 = vadd.f32 %v3733_v33, %v3732_v50 }
 0x312   : > { %v3671_v52 = vpop.f32.mrb[16].mxu0  ;;  %v5859_v14 = vadd.f32 %v3734_v46, %v2389_v1 }
 0x313   : > { %v3672_v34 = vpop.f32.mrb[17].mxu0 }
 0x314   : > { %v3673_v18 = vadd.f32 %v3672_v34, %v3671_v52  ;;  %v3674_v45 = vpop.f32.mrb[18].mxu0  ;;  %v3735_v7 = vpop.f32.mrb[16].mxu1 }
 0x315   : > { %v3675_v8 = vpop.f32.mrb[19].mxu0  ;;  %v3736_v51 = vpop.f32.mrb[17].mxu1 }
 0x316   : > { %v2394_v22 = vadd.f32 %v3673_v18, %v5835_v2  ;;  %v3676_v54 = vadd.f32 %v3675_v8, %v3674_v45  ;;  %v3737_v43 = vadd.f32 %v3736_v51, %v3735_v7  ;;  %v3738_v55 = vpop.f32.mrb[18].mxu1 }
 0x317   : > { %v3739_v48 = vpop.f32.mrb[19].mxu1 }
 0x318   : > { %v2397_v31 = vadd.f32 %v3676_v54, %v5835_v2  ;;  %v5863_v15 = vadd.f32 %v3737_v43, %v2394_v22  ;;  %v3740_v9 = vadd.f32 %v3739_v48, %v3738_v55 }
 0x31a   : > { %v3677_v44 = vpop.f32.mrb[20].mxu0  ;;  %v5865_v5 = vadd.f32 %v3740_v9, %v2397_v31 }
 0x31b   : > { %v3678_v24 = vpop.f32.mrb[21].mxu0 }
 0x31c   : > { %v3679_v26 = vadd.f32 %v3678_v24, %v3677_v44  ;;  %v3680_v13 = vpop.f32.mrb[22].mxu0  ;;  %v3741_v36 = vpop.f32.mrb[20].mxu1 }
 0x31d   : > { %v3681_v17 = vpop.f32.mrb[23].mxu0  ;;  %v3742_v38 = vpop.f32.mrb[21].mxu1 }
 0x31e   : > { %v2402_v60 = vadd.f32 %v3679_v26, %v5835_v2  ;;  %v3682_v0 = vadd.f32 %v3681_v17, %v3680_v13  ;;  %v3743_v53 = vadd.f32 %v3742_v38, %v3741_v36  ;;  %v3744_v10 = vpop.f32.mrb[22].mxu1 }
 0x31f   : > { %v3745_v35 = vpop.f32.mrb[23].mxu1 }
 0x320   : > { %v2405_v63 = vadd.f32 %v3682_v0, %v5835_v2  ;;  %v5869_v62 = vadd.f32 %v3743_v53, %v2402_v60  ;;  %v3746_v12 = vadd.f32 %v3745_v35, %v3744_v10 }
 0x322   : > { %v3683_v42 = vpop.f32.mrb[24].mxu0  ;;  %v5871_v23 = vadd.f32 %v3746_v12, %v2405_v63 }
 0x323   : > { %v3684_v27 = vpop.f32.mrb[25].mxu0 }
 0x324   : > { %v3685_v37 = vadd.f32 %v3684_v27, %v3683_v42  ;;  %v3686_v30 = vpop.f32.mrb[26].mxu0  ;;  %v3747_v49 = vpop.f32.mrb[24].mxu1 }
 0x325   : > { %v3687_v20 = vpop.f32.mrb[27].mxu0  ;;  %v3748_v57 = vpop.f32.mrb[25].mxu1 }
 0x326   : > { %v2410_v41 = vadd.f32 %v3685_v37, %v5835_v2  ;;  %v3688_v28 = vadd.f32 %v3687_v20, %v3686_v30  ;;  %v3749_v29 = vadd.f32 %v3748_v57, %v3747_v49  ;;  %v3750_v21 = vpop.f32.mrb[26].mxu1 }
 0x327   : > { %v3751_v4 = vpop.f32.mrb[27].mxu1 }
 0x328   : > { %v2413_v11 = vadd.f32 %v3688_v28, %v5835_v2  ;;  %v5875_v19 = vadd.f32 %v3749_v29, %v2410_v41  ;;  %v3752_v56 = vadd.f32 %v3751_v4, %v3750_v21 }
 0x32a   : > { %v3689_v59 = vpop.f32.mrb[28].mxu0  ;;  %v5877_v3 = vadd.f32 %v3752_v56, %v2413_v11 }
 0x32b   : > { %v3690_v40 = vpop.f32.mrb[29].mxu0 }
 0x32c   : > { %v3691_v61 = vadd.f32 %v3690_v40, %v3689_v59  ;;  %v3692_v50 = vpop.f32.mrb[30].mxu0  ;;  %v3753_v1 = vpop.f32.mrb[28].mxu1 }
 0x32d   : > { %v3693_v33 = vpop.f32.mrb[31].mxu0  ;;  %v3754_v34 = vpop.f32.mrb[29].mxu1 }
 0x32e   : > { %v2418_v46 = vadd.f32 %v3691_v61, %v5835_v2  ;;  %v3694_v52 = vadd.f32 %v3693_v33, %v3692_v50  ;;  %v3755_v18 = vadd.f32 %v3754_v34, %v3753_v1  ;;  %v3756_v45 = vpop.f32.mrb[30].mxu1 }
 0x32f   : > { %v3757_v8 = vpop.f32.mrb[31].mxu1 }
 0x330   : > { %v2421_v7 = vadd.f32 %v3694_v52, %v5835_v2  ;;  %v5881_v22 = vadd.f32 %v3755_v18, %v2418_v46  ;;  %v3758_v54 = vadd.f32 %v3757_v8, %v3756_v45 }
 0x332   : > { %v3775_v51 = vpop.f32.mrb[32].mxu0  ;;  %v5883_v43 = vadd.f32 %v3758_v54, %v2421_v7 }
 0x333   : > { %v3776_v55 = vpop.f32.mrb[33].mxu0 }
 0x334   : > { %v3777_v31 = vadd.f32 %v3776_v55, %v3775_v51  ;;  %v3778_v48 = vpop.f32.mrb[34].mxu0  ;;  %v3839_v9 = vpop.f32.mrb[32].mxu1 }
 0x335   : > { %v3779_v44 = vpop.f32.mrb[35].mxu0  ;;  %v3840_v13 = vpop.f32.mrb[33].mxu1 }
 0x336   : > { %v2556_v24 = vadd.f32 %v3777_v31, %v5839_v32  ;;  %v3780_v26 = vadd.f32 %v3779_v44, %v3778_v48  ;;  %v3841_v36 = vadd.f32 %v3840_v13, %v3839_v9  ;;  %v3842_v17 = vpop.f32.mrb[34].mxu1 }
 0x337   : > { %v3843_v60 = vpop.f32.mrb[35].mxu1 }
 0x338   : > { %v2559_v2 = vadd.f32 %v3780_v26, %v5841_v47  ;;  %v3844_v0 = vadd.f32 %v3843_v60, %v3842_v17  ;;  %v5887_v38 = vadd.f32 %v3841_v36, %v2556_v24 }
 0x33a   : > { %v3781_v53 = vpop.f32.mrb[36].mxu0  ;;  %v5889_v63 = vadd.f32 %v3844_v0, %v2559_v2 }
 0x33b   : > { %v3782_v10 = vpop.f32.mrb[37].mxu0 }
 0x33c   : > { %v3783_v35 = vadd.f32 %v3782_v10, %v3781_v53  ;;  %v3784_v12 = vpop.f32.mrb[38].mxu0  ;;  %v3845_v42 = vpop.f32.mrb[36].mxu1 }
 0x33d   : > { %v3785_v27 = vpop.f32.mrb[39].mxu0  ;;  %v3846_v30 = vpop.f32.mrb[37].mxu1 }
 0x33e   : > { %v2564_v32 = vadd.f32 %v3783_v35, %v5845_v39  ;;  %v3786_v37 = vadd.f32 %v3785_v27, %v3784_v12  ;;  %v3847_v49 = vadd.f32 %v3846_v30, %v3845_v42  ;;  %v3848_v20 = vpop.f32.mrb[38].mxu1 }
 0x33f   : > { %v3849_v41 = vpop.f32.mrb[39].mxu1 }
 0x340   : > { %v2567_v47 = vadd.f32 %v3786_v37, %v5847_v6  ;;  %v3850_v28 = vadd.f32 %v3849_v41, %v3848_v20  ;;  %v5893_v57 = vadd.f32 %v3847_v49, %v2564_v32 }
 0x342   : > { %v3787_v29 = vpop.f32.mrb[40].mxu0  ;;  %v5895_v11 = vadd.f32 %v3850_v28, %v2567_v47 }
 0x343   : > { %v3788_v21 = vpop.f32.mrb[41].mxu0 }
 0x344   : > { %v3789_v4 = vadd.f32 %v3788_v21, %v3787_v29  ;;  %v3790_v56 = vpop.f32.mrb[42].mxu0  ;;  %v3851_v59 = vpop.f32.mrb[40].mxu1 }
 0x345   : > { %v3791_v40 = vpop.f32.mrb[43].mxu0  ;;  %v3852_v50 = vpop.f32.mrb[41].mxu1 }
 0x346   : > { %v2572_v39 = vadd.f32 %v3789_v4, %v5851_v16  ;;  %v3792_v61 = vadd.f32 %v3791_v40, %v3790_v56  ;;  %v3853_v1 = vadd.f32 %v3852_v50, %v3851_v59  ;;  %v3854_v33 = vpop.f32.mrb[42].mxu1 }
 0x347   : > { %v3855_v46 = vpop.f32.mrb[43].mxu1 }
 0x348   : > { %v2575_v6 = vadd.f32 %v3792_v61, %v5853_v25  ;;  %v3856_v52 = vadd.f32 %v3855_v46, %v3854_v33  ;;  %v5899_v34 = vadd.f32 %v3853_v1, %v2572_v39 }
 0x34a   : > { %v3793_v18 = vpop.f32.mrb[44].mxu0  ;;  %v5901_v7 = vadd.f32 %v3856_v52, %v2575_v6 }
 0x34b   : > { %v3794_v45 = vpop.f32.mrb[45].mxu0 }
 0x34c   : > { %v3795_v8 = vadd.f32 %v3794_v45, %v3793_v18  ;;  %v3796_v54 = vpop.f32.mrb[46].mxu0  ;;  %v3857_v51 = vpop.f32.mrb[44].mxu1 }
 0x34d   : > { %v3797_v55 = vpop.f32.mrb[47].mxu0  ;;  %v3858_v48 = vpop.f32.mrb[45].mxu1 }
 0x34e   : > { %v2580_v16 = vadd.f32 %v3795_v8, %v5857_v58  ;;  %v3798_v31 = vadd.f32 %v3797_v55, %v3796_v54  ;;  %v3859_v9 = vadd.f32 %v3858_v48, %v3857_v51  ;;  %v3860_v44 = vpop.f32.mrb[46].mxu1 }
 0x34f   : > { %v3861_v24 = vpop.f32.mrb[47].mxu1 }
 0x350   : > { %v2583_v25 = vadd.f32 %v3798_v31, %v5859_v14  ;;  %v3862_v26 = vadd.f32 %v3861_v24, %v3860_v44  ;;  %v5905_v13 = vadd.f32 %v3859_v9, %v2580_v16 }
 0x352   : > { %v3799_v36 = vpop.f32.mrb[48].mxu0  ;;  %v5907_v2 = vadd.f32 %v3862_v26, %v2583_v25 }
 0x353   : > { %v3800_v17 = vpop.f32.mrb[49].mxu0 }
 0x354   : > { %v3801_v60 = vadd.f32 %v3800_v17, %v3799_v36  ;;  %v3802_v0 = vpop.f32.mrb[50].mxu0  ;;  %v3863_v53 = vpop.f32.mrb[48].mxu1 }
 0x355   : > { %v3803_v10 = vpop.f32.mrb[51].mxu0  ;;  %v3864_v12 = vpop.f32.mrb[49].mxu1 }
 0x356   : > { %v2588_v58 = vadd.f32 %v3801_v60, %v5863_v15  ;;  %v3804_v35 = vadd.f32 %v3803_v10, %v3802_v0  ;;  %v3865_v42 = vadd.f32 %v3864_v12, %v3863_v53  ;;  %v3866_v27 = vpop.f32.mrb[50].mxu1 }
 0x357   : > { %v3867_v32 = vpop.f32.mrb[51].mxu1 }
 0x358   : > { %v2591_v14 = vadd.f32 %v3804_v35, %v5865_v5  ;;  %v3868_v37 = vadd.f32 %v3867_v32, %v3866_v27  ;;  %v5911_v30 = vadd.f32 %v3865_v42, %v2588_v58 }
 0x35a   : > { %v3805_v49 = vpop.f32.mrb[52].mxu0  ;;  %v5913_v47 = vadd.f32 %v3868_v37, %v2591_v14 }
 0x35b   : > { %v3806_v20 = vpop.f32.mrb[53].mxu0 }
 0x35c   : > { %v3807_v41 = vadd.f32 %v3806_v20, %v3805_v49  ;;  %v3808_v28 = vpop.f32.mrb[54].mxu0  ;;  %v3869_v29 = vpop.f32.mrb[52].mxu1 }
 0x35d   : > { %v3809_v21 = vpop.f32.mrb[55].mxu0  ;;  %v3870_v56 = vpop.f32.mrb[53].mxu1 }
 0x35e   : > { %v2596_v15 = vadd.f32 %v3807_v41, %v5869_v62  ;;  %v3810_v4 = vadd.f32 %v3809_v21, %v3808_v28  ;;  %v3871_v59 = vadd.f32 %v3870_v56, %v3869_v29  ;;  %v3872_v40 = vpop.f32.mrb[54].mxu1 }
 0x35f   : > { %v3873_v39 = vpop.f32.mrb[55].mxu1 }
 0x360   : > { %v2599_v5 = vadd.f32 %v3810_v4, %v5871_v23  ;;  %v3874_v61 = vadd.f32 %v3873_v39, %v3872_v40  ;;  %v5917_v50 = vadd.f32 %v3871_v59, %v2596_v15 }
 0x362   : > { %v3811_v1 = vpop.f32.mrb[56].mxu0  ;;  %v5919_v6 = vadd.f32 %v3874_v61, %v2599_v5 }
 0x363   : > { %v3812_v33 = vpop.f32.mrb[57].mxu0 }
 0x364   : > { %v3813_v46 = vadd.f32 %v3812_v33, %v3811_v1  ;;  %v3814_v52 = vpop.f32.mrb[58].mxu0  ;;  %v3875_v18 = vpop.f32.mrb[56].mxu1 }
 0x365   : > { %v3815_v45 = vpop.f32.mrb[59].mxu0  ;;  %v3876_v54 = vpop.f32.mrb[57].mxu1 }
 0x366   : > { %v2604_v62 = vadd.f32 %v3813_v46, %v5875_v19  ;;  %v3816_v8 = vadd.f32 %v3815_v45, %v3814_v52  ;;  %v3877_v51 = vadd.f32 %v3876_v54, %v3875_v18  ;;  %v3878_v55 = vpop.f32.mrb[58].mxu1 }
 0x367   : > { %v3879_v16 = vpop.f32.mrb[59].mxu1 }
 0x368   : > { %v2607_v23 = vadd.f32 %v3816_v8, %v5877_v3  ;;  %v3880_v31 = vadd.f32 %v3879_v16, %v3878_v55  ;;  %v5923_v48 = vadd.f32 %v3877_v51, %v2604_v62 }
 0x36a   : > { %v3817_v9 = vpop.f32.mrb[60].mxu0  ;;  %v5925_v25 = vadd.f32 %v3880_v31, %v2607_v23 }
 0x36b   : > { %v3818_v44 = vpop.f32.mrb[61].mxu0 }
 0x36c   : > { %v3819_v24 = vadd.f32 %v3818_v44, %v3817_v9  ;;  %v3820_v26 = vpop.f32.mrb[62].mxu0  ;;  %v3881_v36 = vpop.f32.mrb[60].mxu1 }
 0x36d   : > { %v3821_v17 = vpop.f32.mrb[63].mxu0  ;;  %v3882_v0 = vpop.f32.mrb[61].mxu1 }
 0x36e   : > { %v2612_v19 = vadd.f32 %v3819_v24, %v5881_v22  ;;  %v3822_v60 = vadd.f32 %v3821_v17, %v3820_v26  ;;  %v3883_v53 = vadd.f32 %v3882_v0, %v3881_v36  ;;  %v3884_v10 = vpop.f32.mrb[62].mxu1 }
 0x36f   : > { %v3885_v58 = vpop.f32.mrb[63].mxu1 }
 0x370   : > { %v2615_v3 = vadd.f32 %v3822_v60, %v5883_v43  ;;  %v3886_v35 = vadd.f32 %v3885_v58, %v3884_v10  ;;  %v2709_v12 = vadd.f32 %v3883_v53, %v2612_v19  ;;  %v3522_v10 = vld [vmem:[%s5945_s1] sm:$0xff]  }
 0x372   : > { %v3985_v42 = vpop.f32.mrb[64].mxu0  ;;  %v2712_v32 = vadd.f32 %v3886_v35, %v2615_v3  ;;  %v3523_v35 = vunpack.c.l.bf16 %v3522_v10 }
 0x373   : > { %v2758_v27 = vadd.f32 %v3985_v42, %v5893_v57  ;;  %v2749_v14 = vpop.f32.mrb[65].mxu0 }
 0x374   : > { %v2750_v37 = vadd.f32 %v2749_v14, %v5887_v38  ;;  %v3986_v49 = vpop.f32.mrb[66].mxu0 }
 0x375   : > { %v2761_v20 = vadd.f32 %v3986_v49, %v5895_v11  ;;  %v2752_v22 = vpop.f32.mrb[67].mxu0  ;;  %v2814_v28 = vmax.f32 %v2758_v27, 0.0 }
 0x376   : > { %v2753_v41 = vadd.f32 %v2752_v22, %v5889_v63  ;;  %v2812_v21 = vmax.f32 %v2750_v37, 0.0  ;;  %v3524_v37 = vunpack.c.h.bf16 %v3522_v10  ;;  %v3599_v10 = vld [vmem:[%s5945_s1 + $0x38] sm:$0xff]  }
 0x377   : > { %v2815_v29 = vmax.f32 %v2761_v20, 0.0 }
 0x378   : > { %v2813_v43 = vmax.f32 %v2753_v41, 0.0 }
 0x379   : > { %v2829_v15 = vpack.c.bf16 %v2815_v29, %v2814_v28  ;;  %v3595_v29 = vld [vmem:[%s5945_s1 + $0x18] sm:$0xff]  }
 0x37a   : > { %v2828_v4 = vpack.c.bf16 %v2813_v43, %v2812_v21  ;;  %v3989_v56 = vpop.f32.mrb[68].mxu0  ;;  %v3594_v43 = vld [vmem:[%s5945_s1 + $0x10] sm:$0xff]  }
 0x37b   : > { %v2774_v59 = vadd.f32 %v3989_v56, %v5905_v13  ;;  %v2765_v57 = vpop.f32.mrb[69].mxu0 }
 0x37c   : > { %v2766_v40 = vadd.f32 %v2765_v57, %v5899_v34  ;;  %v3990_v5 = vpop.f32.mrb[70].mxu0  ;;  %4015 = vmatprep.mubr.bf16.mxu1 %v2828_v4 }
 0x37d   : > { %v2777_v38 = vadd.f32 %v3990_v5, %v5907_v2  ;;  %v2768_v11 = vpop.f32.mrb[71].mxu0  ;;  %4016 = vmatmul.mubr.bf16.vlgmr.msra.gmra.mrb[64].mxu1 %v2829_v15  ;;  %v2818_v39 = vmax.f32 %v2774_v59, 0.0  ;;  %v3535_v59 = vunpack.c.l.bf16 %v3595_v29 }
 0x37e   : > { %v2769_v63 = vadd.f32 %v2768_v11, %v5901_v7  ;;  %v2816_v1 = vmax.f32 %v2766_v40, 0.0 }
 0x37f   : > { %v2819_v61 = vmax.f32 %v2777_v38, 0.0  ;;  %v3531_v38 = vunpack.c.l.bf16 %v3594_v43 }
 0x380   : > { %v2817_v33 = vmax.f32 %v2769_v63, 0.0 }
 0x381   : > { %v2831_v46 = vpack.c.bf16 %v2819_v61, %v2818_v39  ;;  %v3536_v61 = vunpack.c.h.bf16 %v3595_v29 }
 0x382   : > { %v2830_v52 = vpack.c.bf16 %v2817_v33, %v2816_v1  ;;  %v3993_v18 = vpop.f32.mrb[72].mxu0 }
 0x383   : > { %v2790_v13 = vadd.f32 %v3993_v18, %v5917_v50  ;;  %v2781_v45 = vpop.f32.mrb[73].mxu0 }
 0x384   : > { %v2782_v34 = vadd.f32 %v2781_v45, %v5911_v30  ;;  %v3994_v62 = vpop.f32.mrb[74].mxu0  ;;  %4019 = vmatprep.mubr.bf16.mxu1 %v2830_v52  ;;  %v3532_v52 = vunpack.c.h.bf16 %v3594_v43 }
 0x385   : > { %v2793_v2 = vadd.f32 %v3994_v62, %v5919_v6  ;;  %v2784_v8 = vpop.f32.mrb[75].mxu0  ;;  %4020 = vmatmul.mubr.bf16.gmra.mrb[68].mxu1 %v2831_v46  ;;  %v2822_v54 = vmax.f32 %v2790_v13, 0.0 }
 0x386   : > { %v2785_v7 = vadd.f32 %v2784_v8, %v5913_v47  ;;  %v2820_v55 = vmax.f32 %v2782_v34, 0.0 }
 0x387   : > { %v2823_v51 = vmax.f32 %v2793_v2, 0.0  ;;  %v3597_v2 = vld [vmem:[%s5945_s1 + $0x28] sm:$0xff]  }
 0x388   : > { %v2821_v23 = vmax.f32 %v2785_v7, 0.0  ;;  %v3596_v7 = vld [vmem:[%s5945_s1 + $0x20] sm:$0xff]  }
 0x389   : > { %v2833_v16 = vpack.c.bf16 %v2823_v51, %v2822_v54 }
 0x38a   : > { %v2832_v31 = vpack.c.bf16 %v2821_v23, %v2820_v55  ;;  %v3997_v9 = vpop.f32.mrb[76].mxu0  ;;  %v3543_v23 = vunpack.c.l.bf16 %v3597_v2 }
 0x38b   : > { %v2806_v44 = vadd.f32 %v3997_v9, %v2709_v12  ;;  %v2797_v50 = vpop.f32.mrb[77].mxu0 }
 0x38c   : > { %v2798_v30 = vadd.f32 %v2797_v50, %v5923_v48  ;;  %v3998_v24 = vpop.f32.mrb[78].mxu0  ;;  %4023 = vmatprep.mubr.bf16.mxu1 %v2832_v31  ;;  %v3593_v48 = vld [vmem:[%s5945_s1 + $0x8] sm:$0xff]  }
 0x38d   : > { %v2809_v6 = vadd.f32 %v3998_v24, %v2712_v32  ;;  %v2800_v26 = vpop.f32.mrb[79].mxu0  ;;  %4024 = vmatmul.mubr.bf16.gmra.mrb[72].mxu1 %v2833_v16  ;;  %v2826_v36 = vmax.f32 %v2806_v44, 0.0  ;;  %v3527_v3 = vunpack.c.l.bf16 %v3593_v48  ;;  %v3528_v27 = vunpack.c.h.bf16 %v3593_v48 }
 0x38e   : > { %v2801_v47 = vadd.f32 %v2800_v26, %v5925_v25  ;;  %v2824_v19 = vmax.f32 %v2798_v30, 0.0  ;;  %v5952_v25 = vld [vmem:[%s6260_s20] ss:$0 sm:$0xff]  ;;  %v3539_v44 = vunpack.c.l.bf16 %v3596_v7  ;;  %s4409_s20 = scalar_lea.vmem %s4408_s13, 2048 }
 0x38f   : > { %v2827_v17 = vmax.f32 %v2809_v6, 0.0  ;;  %v3544_v6 = vunpack.c.h.bf16 %v3597_v2 }
 0x390   : > { %v2825_v60 = vmax.f32 %v2801_v47, 0.0 }
 0x391   : > { %v2835_v0 = vpack.c.bf16 %v2827_v17, %v2826_v36  ;;  %v3540_v17 = vunpack.c.h.bf16 %v3596_v7 }
 0x392   : > { %v2834_v53 = vpack.c.bf16 %v2825_v60, %v2824_v19 }
 0x394   : > { %4027 = vmatprep.mubr.bf16.mxu1 %v2834_v53 }
 0x395   : > { %4028 = vmatmul.mubr.bf16.gmra.mrb[76].mxu1 %v2835_v0 }
 0x450   : > { %v4017_v58 = vpop.f32.mrb[64].mxu1 }
 0x451   : > { %v2985_v12 = vadd.f32 %v4017_v58, %v5952_v25  ;;  %v2976_v42 = vpop.f32.mrb[65].mxu1  ;;  %v3598_v58 = vld [vmem:[%s5945_s1 + $0x30] sm:$0xff]   ;;  %s4403_s1 = scalar_lea.vmem %s5990_s6, 1024 }
 0x452   : > { %v2977_v14 = vadd.f32 %v5952_v25, %v2976_v42  ;;  %v4018_v32 = vpop.f32.mrb[66].mxu1  ;;  %p4404_p2 = scmp.ne.s32.totalorder %s5990_s6, %s4403_s1  ;;  %p4411_p8 = scmp.lt.s32.totalorder %s4409_s20, %s4403_s1 }
 0x453   : > { %v3041_v49 = vadd.f32 %v3527_v3, %v2985_v12  ;;  %v2988_v20 = vadd.f32 %v4018_v32, %v5952_v25  ;;  %v2979_v22 = vpop.f32.mrb[67].mxu1 }
 0x454   : > { %v3039_v41 = vadd.f32 %v3523_v35, %v2977_v14  ;;  %v2980_v28 = vadd.f32 %v5952_v25, %v2979_v22  ;;  %p4405_p5 = pnand %p4404_p2, %p6264_p9  ;;  %p4412_p12 = por %p4411_p8, %p4410_p6 }
 0x455   : > { %v3042_v21 = vadd.f32 %v3528_v27, %v2988_v20  ;;  %v3057_v4 = vmax.f32 %v3041_v49, 0.0  ;;  %v3551_v27 = vunpack.c.l.bf16 %v3599_v10  ;;  %v3547_v49 = vunpack.c.l.bf16 %v3598_v58 }
 0x456   : > { %v3040_v15 = vadd.f32 %v3524_v37, %v2980_v28  ;;  %v3055_v57 = vmax.f32 %v3039_v41, 0.0  ;;  %v3552_v28 = vunpack.c.h.bf16 %v3599_v10  ;;  %p4406_p13 = pneg %p4405_p5 }
 0x457   : > { %v3058_v56 = vmax.f32 %v3042_v21, 0.0 }
 0x458   : > { %v3056_v40 = vmax.f32 %v3040_v15, 0.0  ;;  %v4021_v5 = vpop.f32.mrb[68].mxu1  ;;  %v3548_v15 = vunpack.c.h.bf16 %v3598_v58  ;;  %p4413_p4 = pnand %p4412_p12, %p4406_p13 }
 0x459   : > { %v3561_v11 = vpack.c.bf16 %v3058_v56, %v3057_v4  ;;  %v3001_v63 = vadd.f32 %v4021_v5, %v5952_v25  ;;  %v2992_v39 = vpop.f32.mrb[69].mxu1 }
 0x45a   : > { %v3556_v1 = vpack.c.bf16 %v3056_v40, %v3055_v57  ;;  %v2993_v33 = vadd.f32 %v5952_v25, %v2992_v39  ;;  %v4022_v46 = vpop.f32.mrb[70].mxu1 }
 0x45b   : > { %3600 = vst [vmem:[%s4860_s15 + $0x8] sm:$0xff] %v3561_v11   ;;  %v3045_v18 = vadd.f32 %v3535_v59, %v3001_v63  ;;  %v3004_v13 = vadd.f32 %v4022_v46, %v5952_v25  ;;  %v2995_v45 = vpop.f32.mrb[71].mxu1 }
 0x45c   : > { %3557 = vst [vmem:[%s4860_s15] sm:$0xff] %v3556_v1   ;;  %v3043_v34 = vadd.f32 %v3531_v38, %v2993_v33  ;;  %v2996_v62 = vadd.f32 %v5952_v25, %v2995_v45 }
 0x45d   : > { %v3046_v8 = vadd.f32 %v3536_v61, %v3004_v13  ;;  %v3061_v51 = vmax.f32 %v3045_v18, 0.0 }
 0x45e   : > { %v3044_v54 = vadd.f32 %v3532_v52, %v2996_v62  ;;  %v3059_v16 = vmax.f32 %v3043_v34, 0.0 }
 0x45f   : > { %v3062_v55 = vmax.f32 %v3046_v8, 0.0 }
 0x460   : > { %v3060_v31 = vmax.f32 %v3044_v54, 0.0  ;;  %v4025_v9 = vpop.f32.mrb[72].mxu1 }
 0x461   : > { %v3571_v50 = vpack.c.bf16 %v3062_v55, %v3061_v51  ;;  %v3017_v30 = vadd.f32 %v4025_v9, %v5952_v25  ;;  %v3008_v24 = vpop.f32.mrb[73].mxu1 }
 0x462   : > { %v3566_v26 = vpack.c.bf16 %v3060_v31, %v3059_v16  ;;  %v3009_v47 = vadd.f32 %v5952_v25, %v3008_v24  ;;  %v4026_v36 = vpop.f32.mrb[74].mxu1 }
 0x463   : > { %3602 = vst [vmem:[%s4860_s15 + $0x18] sm:$0xff] %v3571_v50   ;;  %v3049_v19 = vadd.f32 %v3543_v23, %v3017_v30  ;;  %v3020_v60 = vadd.f32 %v4026_v36, %v5952_v25  ;;  %v3011_v0 = vpop.f32.mrb[75].mxu1 }
 0x464   : > { %3601 = vst [vmem:[%s4860_s15 + $0x10] sm:$0xff] %v3566_v26   ;;  %v3047_v53 = vadd.f32 %v3539_v44, %v3009_v47  ;;  %v3012_v48 = vadd.f32 %v5952_v25, %v3011_v0 }
 0x465   : > { %v3050_v3 = vadd.f32 %v3544_v6, %v3020_v60  ;;  %v3065_v12 = vmax.f32 %v3049_v19, 0.0 }
 0x466   : > { %v3048_v35 = vadd.f32 %v3540_v17, %v3012_v48  ;;  %v3063_v14 = vmax.f32 %v3047_v53, 0.0 }
 0x467   : > { %v3066_v42 = vmax.f32 %v3050_v3, 0.0 }
 0x468   : > { %v3064_v32 = vmax.f32 %v3048_v35, 0.0  ;;  %v4029_v37 = vpop.f32.mrb[76].mxu1 }
 0x469   : > { %v3581_v20 = vpack.c.bf16 %v3066_v42, %v3065_v12  ;;  %v3033_v22 = vadd.f32 %v4029_v37, %v5952_v25  ;;  %v3024_v41 = vpop.f32.mrb[77].mxu1 }
 0x46a   : > { %v3576_v29 = vpack.c.bf16 %v3064_v32, %v3063_v14  ;;  %v3025_v21 = vadd.f32 %v5952_v25, %v3024_v41  ;;  %v4030_v43 = vpop.f32.mrb[78].mxu1 }
 0x46b   : > { %3604 = vst [vmem:[%s4860_s15 + $0x28] sm:$0xff] %v3581_v20   ;;  %v3053_v4 = vadd.f32 %v3551_v27, %v3033_v22  ;;  %v3036_v56 = vadd.f32 %v4030_v43, %v5952_v25  ;;  %v3027_v59 = vpop.f32.mrb[79].mxu1 }
 0x46c   : > { %3603 = vst [vmem:[%s4860_s15 + $0x20] sm:$0xff] %v3576_v29   ;;  %v3051_v57 = vadd.f32 %v3547_v49, %v3025_v21  ;;  %v3028_v40 = vadd.f32 %v5952_v25, %v3027_v59 }
 0x46d   : > { %v3054_v5 = vadd.f32 %v3552_v28, %v3036_v56  ;;  %v3069_v11 = vmax.f32 %v3053_v4, 0.0 }
 0x46e   : > { %v3052_v38 = vadd.f32 %v3548_v15, %v3028_v40  ;;  %v3067_v39 = vmax.f32 %v3051_v57, 0.0 }
 0x46f   : > { %v3070_v63 = vmax.f32 %v3054_v5, 0.0 }
 0x470   : > { %v3068_v61 = vmax.f32 %v3052_v38, 0.0 }
 0x471   : > { %v3591_v1 = vpack.c.bf16 %v3070_v63, %v3069_v11 }
 0x472   : > { %v3586_v25 = vpack.c.bf16 %v3068_v61, %v3067_v39 }
 0x473   : > { %3606 = vst [vmem:[%s4860_s15 + $0x38] sm:$0xff] %v3591_v1  }
 0x474   : > { %3605 = vst [vmem:[%s4860_s15 + $0x30] sm:$0xff] %v3586_v25  }
 0x475   : > { %4416 = shalt.err (!%p4413_p4)
}
 0x476   : > { %s4417_s3 = scalar_lea.hbm %s5988_s2, 1024  ;;  %s4421_s19 = scalar_lea.hbm %s6263_s21, 4096 }
 0x477   : > { %p4418_p7 = scmp.ne.s32.totalorder %s5988_s2, %s4417_s3  ;;  %p4422_p1 = scmp.lt.u32.totalorder %s5988_s2, %s6263_s21 }
 0x478   : > { %p4423_p11 = scmp.lt.u32.totalorder %s4421_s19, %s4417_s3  ;;  %p4425_p2 = scmp.lt.u32.totalorder %s4417_s3, %s5988_s2 }
 0x479   : > { %p4419_p3 = pnand %p4418_p7, %p6264_p9 }
 0x47a   : > { %p4424_p10 = por %p4423_p11, %p4422_p1 }
 0x47b   : > { %p4420_p0 = pneg %p4419_p3 }
 0x47c   : > { %p4426_p5 = por %p4425_p2, %p4424_p10 }
 0x47e   : > { %p4427_p13 = pnand %p4426_p5, %p4420_p0 }
 0x480   : > { %4430 = shalt.err (!%p4427_p13)
}
 0x481   : > { %s4543_s4 = smov 64   ;;  %s4544_s8 = smov 4  }
 0x482   : > { %4061 = dma.vmem_to_hbm [thread:$0]  (%p6264_p9), %s5990_s6, 1024, %s5988_s2, %s5996_s24, %s4543_s4, %s4543_s4, %s4544_s8  }
 0x483 PF: > { %s6265_s12 = sld [smem:[#allocation16_spill]]  ;;  %s6266_s1 = sld [smem:[#allocation19_spill]] }
 0x484   : > { %p4088_p6 = scmp.ge.s32.totalorder %s4533_s11, 2 }
 0x489   : > { %s3183_s18 = sand.u32 1, %s6265_s12   ;;  %p6267_p8 = scmp.ne.s32.totalorder %s6266_s1, 0 }
 0x48a   : > { %s3184_s13 = scalar_lea.sflag [#allocation5], %s3183_s18 }
 0x48b   : > { %p4078_p12 = pnand %p4088_p6, %p6267_p8 }
 0x48d   : > { %4488 = dma.done.wait (!%p4078_p12), %s3184_s13, 1024  }
 0x48e   : > { %4490 = vsyncadd (!%p4078_p12), %s3184_s13, 4294966272  ;;  %s25_s11 = sadd.s32 1, %s4533_s11   ;;  %s6268_s24 = smov %s4497_s25 }
 0x48f   : > { %p22_p4 = scmp.ge.s32.totalorder %s25_s11, 6   ;;  %s6269_s25 = smov %s4501_s26 }
 0x490   : > { %s6270_s26 = smov %s4792_s27  ;;  %s6271_s27 = smov %s4509_s28 }
 0x491   : > { %s6272_s28 = smov %s4513_s29  ;;  %s6273_s29 = smov %s4787_s7 }
 0x492   : > { %s6274_s30 = smov %s4525_s9  ;;  %s6275_s8 = smov %s4529_s10 }
 0x493   : > { %s6276_s9 = smov %s6279_s17  ;;  %s6277_s10 = smov %s6283_s22 }
 0x494   :  { %24 = sbr.rel (!%p22_p4) target bundleno = 18 (0x12), region = 115 }
 0x49b   :  { %3189 = vsyncpa [#allocation4], 1 }
 0x49c   :  { %3191 = vsyncpa [#allocation4 + $0x1], 1 }
 0x49d   :  { %3192 = vsyncpa [#allocation7], 1 }
 0x49e   :  { %3193 = vsyncpa [#allocation10], 1 }
 0x49f   :  { %3194 = vsyncpa [#allocation5], 1 }
 0x4a0   :  { %3196 = vsyncpa [#allocation5 + $0x1], 1 }

</bundles_post_ra>
